<compile_context>
chip_gen: v7x
topology: tpu7x:2x2x1
jax: 0.10.0
libtpu: 0.0.40
codegen_flags: <defaults>
</compile_context>

<pallas_src>
import numpy as np
import jax
import jax.numpy as jnp
from jax.experimental import pallas as pl
from jax.experimental.pallas import tpu as pltpu


def _softplus(x):
    # torch.nn.functional.softplus semantics (beta=1, threshold=20).  log(1+t)
    # instead of log1p for guaranteed Mosaic lowering; the difference only
    # shows up far below the 1e-4 clip applied to disp.
    return jnp.where(x > 20.0, x, jnp.log(1.0 + jnp.exp(jnp.minimum(x, 20.0))))


def _round_up(n, m):
    return ((n + m - 1) // m) * m


def _vmem_limit_bytes():
    """VMEM limit with headroom for Mosaic internal scratch (never 100%).

    v7x: 64 MiB physical -> ~52 MiB usable; v5e/v6e: 128 MiB -> ~105 MiB.
    """
    cap = 64 * 1024 * 1024                      # conservative fallback (v7x)
    try:
        cap = int(pltpu.get_tpu_info().vmem_capacity_bytes)
    except Exception:
        pass
    return int(cap * 0.82)


def scaclc_forward(x, eps, eps0, p, *, tile_b=1024, use_bf16=True):
    """Fused scAClcContrastive forward.

    Returns (z_mu, z_logvar, mean, disp, pi, q, h), matching the PyTorch
    module.  use_bf16=True (production default) streams x / large outputs in
    bf16 with bf16 MXU operands (f32 accumulation); use_bf16=False is a
    bit-careful f32 path used by the tight reference check.
    """
    B, D_in = x.shape
    Z = p["w_mu"].shape[1]
    K = p["cluster_mu"].shape[0]
    C = p["w_c"].shape[1]
    E1 = p["w_e1"].shape[1]
    E2 = p["w_e2"].shape[1]
    D1 = p["w_d1"].shape[1]
    D2 = p["w_d2"].shape[1]

    f32 = jnp.float32
    mxu_dtype = jnp.bfloat16 if use_bf16 else f32
    out_dtype = jnp.bfloat16 if use_bf16 else f32

    Zp = _round_up(Z, 128)              # lane-padded latent dim
    K_pad = _round_up(max(K, 1), 128)   # lane-dense q output
    C_pad = _round_up(max(C, 1), 128)   # lane-dense h output

    # ------------------------------------------------------------ VMEM / TB
    vmem_limit = _vmem_limit_bytes()
    b_in = 2 if use_bf16 else 4
    b_out = 2 if use_bf16 else 4
    b_w = 2 if use_bf16 else 4
    # Resident (grid-invariant) weights are still double-buffered by the
    # default pipeline -> count them twice.
    # TODO(synk): pipeline_mode=pl.Buffered(1) on the resident specs would
    # halve this; left at default buffering for portability across JAX versions.
    resident_bytes = 2 * (
        b_w * (D_in * E1 + E1 * E2 + E2 * 2 * Zp + Zp * D1 + D1 * D2
               + 3 * D2 * D_in + Zp * (K_pad + C_pad))
        + 4 * (E1 + E2 + 2 * Zp + D1 + D2 + 3 * D_in + K_pad + C_pad))
    # Streamed bytes per batch row (double-buffered in/out tiles) plus a rough
    # allowance for live f32 intermediates / compiler temporaries.
    per_row_bytes = (
        2 * D_in * b_in                           # x tile
        + 2 * 2 * Zp * 4                          # eps | eps0 pack
        + 2 * 2 * Zp * 4                          # zstats out (kept f32)
        + 2 * 3 * D_in * b_out                    # mean / disp / pi outs
        + 2 * (K_pad + C_pad) * b_out             # q / h outs
        + 4 * (E1 + E2 + 6 * Zp + D1 + D2 + 2 * D_in + K_pad + C_pad))
    budget = int(vmem_limit * 0.9) - resident_bytes
    tb_fit = 8
    if budget > 0:
        tb_fit = max(8, (budget // per_row_bytes) // 8 * 8)
    TB = min(_round_up(B, 8), int(tile_b), tb_fit)
    if B >= 16:
        # Keep >= 2 grid steps so both v7x TensorCores get work and the
        # input/output pipeline actually overlaps.
        TB = min(TB, _round_up((B + 1) // 2, 8))
    TB = max(8, (TB // 8) * 8)

    # --------------------------------------------- wrapper-side param prep
    x_in = x.astype(mxu_dtype)
    eps_pack = (jnp.zeros((B, 2 * Zp), f32)
                .at[:, :Z].set(eps).at[:, Zp:Zp + Z].set(eps0))

    w_e1 = p["w_e1"].astype(mxu_dtype)
    w_e2 = p["w_e2"].astype(mxu_dtype)
    w_d2 = p["w_d2"].astype(mxu_dtype)
    w_mean = p["w_mean"].astype(mxu_dtype)
    w_disp = p["w_disp"].astype(mxu_dtype)
    w_pi = p["w_pi"].astype(mxu_dtype)

    # mu | logvar head: each half padded to a 128-lane boundary so both the
    # in-kernel mu/logvar slices and the zstats store are vreg-aligned.
    w_mv = (jnp.zeros((E2, 2 * Zp), f32)
            .at[:, :Z].set(p["w_mu"]).at[:, Zp:Zp + Z].set(p["w_var"])
            ).astype(mxu_dtype)
    b_mv = (jnp.zeros((1, 2 * Zp), f32)
            .at[:, :Z].set(p["b_mu"]).at[:, Zp:Zp + Z].set(p["b_var"]))

    # Decoder first layer consumes the Zp-padded z (padded rows are zero).
    w_d1 = (jnp.zeros((Zp, D1), f32).at[:Z, :].set(p["w_d1"])).astype(mxu_dtype)

    # Fused soft-assign + contrastive weight (same z0 LHS, one MXU pass):
    #   cols [:K_pad)  -> -2*mu_c^T with bias ||mu_c||^2 (pad cols biased 1e30
    #                     so 1/(1+dist) underflows -> no iota/where mask)
    #   cols [K_pad:)  -> contrastive head weight / bias
    cmu = p["cluster_mu"]
    w_zc = (jnp.zeros((Zp, K_pad + C_pad), f32)
            .at[:Z, :K].set(-2.0 * cmu.T)
            .at[:Z, K_pad:K_pad + C].set(p["w_c"])).astype(mxu_dtype)
    b_zc = (jnp.zeros((1, K_pad + C_pad), f32)
            .at[:, :K].set(jnp.sum(cmu * cmu, axis=1)[None, :])
            .at[:, K:K_pad].set(1e30)
            .at[:, K_pad:K_pad + C].set(p["b_c"]))

    # ---------------------------------------------------------------- kernel
    def kernel(x_ref, eps_ref,
               we1_ref, be1_ref, we2_ref, be2_ref,
               wmv_ref, bmv_ref,
               wd1_ref, bd1_ref, wd2_ref, bd2_ref,
               wmean_ref, bmean_ref, wdisp_ref, bdisp_ref, wpi_ref, bpi_ref,
               wzc_ref, bzc_ref,
               zstats_ref, mean_ref, disp_ref, pi_ref, q_ref, h_ref):

        def linear(v, w_ref, b_ref):
            return jnp.dot(v.astype(w_ref.dtype), w_ref[...],
                           preferred_element_type=f32) + b_ref[...]

        def relu(t):
            return jnp.maximum(t, 0.0)

        xv = x_ref[...]

        # Encoder (sigma == 0 -> no input corruption).  The PyTorch module runs
        # the deterministic encoder twice on the same x, so the two passes only
        # differ through the fresh eps draw (eps vs eps0).
        h1 = relu(linear(xv, we1_ref, be1_ref))
        h2 = relu(linear(h1, we2_ref, be2_ref))
        zstats = linear(h2, wmv_ref, bmv_ref)          # (TB, 2*Zp) = mu|logvar
        zstats_ref[...] = zstats
        mu_p = zstats[:, :Zp]
        lv_p = zstats[:, Zp:]
        std_p = jnp.exp(0.5 * lv_p)                    # pad lanes: exp(0) = 1
        ev = eps_ref[...]
        z = mu_p + ev[:, :Zp] * std_p                  # pad lanes stay 0
        z0 = mu_p + ev[:, Zp:] * std_p

        # Decoder on z (not z0): three separate heads, activations stored
        # straight into their outputs (no (TB, 3*D_in) intermediate).
        d1 = relu(linear(z, wd1_ref, bd1_ref))
        d2 = relu(linear(d1, wd2_ref, bd2_ref))
        mean_ref[...] = jnp.clip(jnp.exp(linear(d2, wmean_ref, bmean_ref)),
                                 1e-5, 1e6).astype(mean_ref.dtype)
        disp_ref[...] = jnp.clip(_softplus(linear(d2, wdisp_ref, bdisp_ref)),
                                 1e-4, 1e4).astype(disp_ref.dtype)
        # sigmoid(x) = 0.5*(tanh(0.5x)+1): one EUP op on the (TB, D_in) slab.
        pi_ref[...] = (0.5 * (jnp.tanh(0.5 * linear(d2, wpi_ref, bpi_ref))
                              + 1.0)).astype(pi_ref.dtype)

        # Fused soft_assign (Student-t, alpha=1) + contrastive head on z0.
        zc = linear(z0, wzc_ref, bzc_ref)              # (TB, K_pad + C_pad)
        qc = zc[:, :K_pad]                             # -2 z0.mu^T + ||mu||^2
        hc = zc[:, K_pad:]
        z0_sq = jnp.sum(z0 * z0, axis=1, keepdims=True)
        dist = jnp.maximum(z0_sq + qc, 0.0)            # pad cols ~1e30
        qq = pl.reciprocal(1.0 + dist, approx=True)    # pad cols underflow ~0
        q_ref[...] = (qq * pl.reciprocal(jnp.sum(qq, axis=1, keepdims=True),
                                         approx=True)).astype(q_ref.dtype)
        h_ref[...] = relu(hc).astype(h_ref.dtype)

    # ----------------------------------------------------------------- specs
    def btile(n):
        return pl.BlockSpec((TB, n), lambda i: (i, 0))

    def resident(a):
        # Whole array, constant block index -> DMA'd once, stays VMEM-resident.
        return pl.BlockSpec(a.shape, lambda i: (0, 0))

    args = (x_in, eps_pack,
            w_e1, p["b_e1"], w_e2, p["b_e2"],
            w_mv, b_mv,
            w_d1, p["b_d1"], w_d2, p["b_d2"],
            w_mean, p["b_mean"], w_disp, p["b_disp"], w_pi, p["b_pi"],
            w_zc, b_zc)
    in_specs = [btile(D_in), btile(2 * Zp)] + [resident(a) for a in args[2:]]
    out_specs = (btile(2 * Zp), btile(D_in), btile(D_in), btile(D_in),
                 btile(K_pad), btile(C_pad))
    out_shape = (
        jax.ShapeDtypeStruct((B, 2 * Zp), f32),        # mu | logvar (f32)
        jax.ShapeDtypeStruct((B, D_in), out_dtype),    # mean
        jax.ShapeDtypeStruct((B, D_in), out_dtype),    # disp
        jax.ShapeDtypeStruct((B, D_in), out_dtype),    # pi
        jax.ShapeDtypeStruct((B, K_pad), out_dtype),   # q (lane padded)
        jax.ShapeDtypeStruct((B, C_pad), out_dtype),   # h (lane padded)
    )

    zstats, mean, disp, pi, q_pad, h_pad = pl.pallas_call(
        kernel,
        out_shape=out_shape,
        grid=(pl.cdiv(B, TB),),
        in_specs=in_specs,
        out_specs=out_specs,
        compiler_params=pltpu.CompilerParams(
            dimension_semantics=("parallel",),
            vmem_limit_bytes=vmem_limit),
    )(*args)

    return (zstats[:, :Z], zstats[:, Zp:Zp + Z], mean, disp, pi,
            q_pad[:, :K], h_pad[:, :C])


def reference_forward(x, eps, eps0, p):
    # Pure-JAX reference with identical (unfused) math, full-f32 matmuls.
    hp = jax.lax.Precision.HIGHEST
    relu = lambda t: jnp.maximum(t, 0.0)
    lin = lambda v, w, b: jnp.dot(v, w, precision=hp) + b
    h2 = relu(lin(relu(lin(x, p["w_e1"], p["b_e1"])), p["w_e2"], p["b_e2"]))
    z_mu = lin(h2, p["w_mu"], p["b_mu"])
    z_logvar = lin(h2, p["w_var"], p["b_var"])
    std = jnp.exp(0.5 * z_logvar)
    z = z_mu + eps * std
    z0 = z_mu + eps0 * std
    d2 = relu(lin(relu(lin(z, p["w_d1"], p["b_d1"])), p["w_d2"], p["b_d2"]))
    mean = jnp.clip(jnp.exp(lin(d2, p["w_mean"], p["b_mean"])), 1e-5, 1e6)
    disp = jnp.clip(_softplus(lin(d2, p["w_disp"], p["b_disp"])), 1e-4, 1e4)
    pi = jax.nn.sigmoid(lin(d2, p["w_pi"], p["b_pi"]))
    cmu = p["cluster_mu"]
    dist = jnp.sum((z0[:, None, :] - cmu[None, :, :]) ** 2, axis=2)
    qq = 1.0 / (1.0 + dist)
    q = qq / jnp.sum(qq, axis=1, keepdims=True)
    h = relu(lin(z0, p["w_c"], p["b_c"]))
    return z_mu, z_logvar, mean, disp, pi, q, h


def init_params(key, input_dim, enc_layers, dec_layers, z_dim, n_clusters,
                contrastive_dim=128):
    ks = jax.random.split(key, 12)

    def kaiming(k, fin, fout):
        # kaiming_normal_ (fan_in, relu gain): std = sqrt(2 / fan_in)
        return jax.random.normal(k, (fin, fout), jnp.float32) * np.sqrt(2.0 / fin)

    def zb(n):
        return jnp.zeros((1, n), jnp.float32)

    p = {}
    p["w_e1"], p["b_e1"] = kaiming(ks[0], input_dim, enc_layers[0]), zb(enc_layers[0])
    p["w_e2"], p["b_e2"] = kaiming(ks[1], enc_layers[0], enc_layers[1]), zb(enc_layers[1])
    p["w_mu"], p["b_mu"] = kaiming(ks[2], enc_layers[1], z_dim), zb(z_dim)
    p["w_var"], p["b_var"] = kaiming(ks[3], enc_layers[1], z_dim), zb(z_dim)
    p["w_d1"], p["b_d1"] = kaiming(ks[4], z_dim, dec_layers[0]), zb(dec_layers[0])
    p["w_d2"], p["b_d2"] = kaiming(ks[5], dec_layers[0], dec_layers[1]), zb(dec_layers[1])
    p["w_mean"], p["b_mean"] = kaiming(ks[6], dec_layers[1], input_dim), zb(input_dim)
    p["w_disp"], p["b_disp"] = kaiming(ks[7], dec_layers[1], input_dim), zb(input_dim)
    p["w_pi"], p["b_pi"] = kaiming(ks[8], dec_layers[1], input_dim), zb(input_dim)
    p["w_c"], p["b_c"] = kaiming(ks[9], z_dim, contrastive_dim), zb(contrastive_dim)
    # TODO(synk): self.mu (cluster centers) is set by k-means during training
    # in the original code (not in __init__); initialized randomly here.
    p["cluster_mu"] = jax.random.normal(ks[10], (n_clusters, z_dim), jnp.float32)
    return p


if __name__ == "__main__":
    B, D_IN, Z, K, C = 8, 128, 32, 10, 128
    ENC_LAYERS = [128, 64]
    DEC_LAYERS = [64, 128]

    key = jax.random.PRNGKey(0)
    k_params, k_x, k_eps, k_eps0 = jax.random.split(key, 4)

    params = init_params(k_params, D_IN, ENC_LAYERS, DEC_LAYERS, Z, K, C)
    x = jax.random.normal(k_x, (B, D_IN), jnp.float32)
    # torch.randn reparameterization noise, generated outside the kernel:
    eps = jax.random.normal(k_eps, (B, Z), jnp.float32)
    eps0 = jax.random.normal(k_eps0, (B, Z), jnp.float32)

    refs = reference_forward(x, eps, eps0, params)

    # f32 path: tight correctness check.
    outs = jax.block_until_ready(
        scaclc_forward(x, eps, eps0, params, use_bf16=False))
    for o, r in zip(outs, refs):
        np.testing.assert_allclose(np.asarray(o.astype(jnp.float32)),
                                   np.asarray(r), rtol=5e-3, atol=1e-2)

    # Production bf16-I/O path: loose sanity check (bf16 streams + bf16 MXU
    # operands accumulate rounding that exp()/softplus amplify).
    outs_bf = jax.block_until_ready(
        scaclc_forward(x, eps, eps0, params, use_bf16=True))
    for o, r in zip(outs_bf, refs):
        np.testing.assert_allclose(np.asarray(o.astype(jnp.float32)),
                                   np.asarray(r), rtol=2.5e-1, atol=2.5e-1)

    print("KERNEL_OK")
</pallas_src>

<mosaic_0001>
module attributes {stable_mosaic.version = 11 : i64} {
  func.func @kernel(%arg0: i32, %arg1: memref<8x128xf32, #tpu.memory_space<vmem>>, %arg2: memref<8x256xf32, #tpu.memory_space<vmem>>, %arg3: memref<128x128xf32, #tpu.memory_space<vmem>>, %arg4: memref<1x128xf32, #tpu.memory_space<vmem>>, %arg5: memref<128x64xf32, #tpu.memory_space<vmem>>, %arg6: memref<1x64xf32, #tpu.memory_space<vmem>>, %arg7: memref<64x256xf32, #tpu.memory_space<vmem>>, %arg8: memref<1x256xf32, #tpu.memory_space<vmem>>, %arg9: memref<128x64xf32, #tpu.memory_space<vmem>>, %arg10: memref<1x64xf32, #tpu.memory_space<vmem>>, %arg11: memref<64x128xf32, #tpu.memory_space<vmem>>, %arg12: memref<1x128xf32, #tpu.memory_space<vmem>>, %arg13: memref<128x128xf32, #tpu.memory_space<vmem>>, %arg14: memref<1x128xf32, #tpu.memory_space<vmem>>, %arg15: memref<128x128xf32, #tpu.memory_space<vmem>>, %arg16: memref<1x128xf32, #tpu.memory_space<vmem>>, %arg17: memref<128x128xf32, #tpu.memory_space<vmem>>, %arg18: memref<1x128xf32, #tpu.memory_space<vmem>>, %arg19: memref<128x256xf32, #tpu.memory_space<vmem>>, %arg20: memref<1x256xf32, #tpu.memory_space<vmem>>, %arg21: memref<8x256xf32, #tpu.memory_space<vmem>>, %arg22: memref<8x128xf32, #tpu.memory_space<vmem>>, %arg23: memref<8x128xf32, #tpu.memory_space<vmem>>, %arg24: memref<8x128xf32, #tpu.memory_space<vmem>>, %arg25: memref<8x128xf32, #tpu.memory_space<vmem>>, %arg26: memref<8x128xf32, #tpu.memory_space<vmem>>) attributes {dimension_semantics = [#tpu.dimension_semantics<parallel>], iteration_bounds = array<i64: 1>, scalar_prefetch = 0 : i64, scratch_operands = 0 : i64, tpu.core_type = #tpu.core_type<tc>, window_params = [{transform_indices = @transform_0, window_bounds = array<i64: 8, 128>}, {transform_indices = @transform_1, window_bounds = array<i64: 8, 256>}, {pipeline_mode = #tpu.pipeline_mode<synchronous>, transform_indices = @transform_2, window_bounds = array<i64: 128, 128>}, {pipeline_mode = #tpu.pipeline_mode<synchronous>, transform_indices = @transform_3, window_bounds = array<i64: 1, 128>}, {pipeline_mode = #tpu.pipeline_mode<synchronous>, transform_indices = @transform_4, window_bounds = array<i64: 128, 64>}, {pipeline_mode = #tpu.pipeline_mode<synchronous>, transform_indices = @transform_5, window_bounds = array<i64: 1, 64>}, {pipeline_mode = #tpu.pipeline_mode<synchronous>, transform_indices = @transform_6, window_bounds = array<i64: 64, 256>}, {pipeline_mode = #tpu.pipeline_mode<synchronous>, transform_indices = @transform_7, window_bounds = array<i64: 1, 256>}, {pipeline_mode = #tpu.pipeline_mode<synchronous>, transform_indices = @transform_8, window_bounds = array<i64: 128, 64>}, {pipeline_mode = #tpu.pipeline_mode<synchronous>, transform_indices = @transform_9, window_bounds = array<i64: 1, 64>}, {pipeline_mode = #tpu.pipeline_mode<synchronous>, transform_indices = @transform_10, window_bounds = array<i64: 64, 128>}, {pipeline_mode = #tpu.pipeline_mode<synchronous>, transform_indices = @transform_11, window_bounds = array<i64: 1, 128>}, {pipeline_mode = #tpu.pipeline_mode<synchronous>, transform_indices = @transform_12, window_bounds = array<i64: 128, 128>}, {pipeline_mode = #tpu.pipeline_mode<synchronous>, transform_indices = @transform_13, window_bounds = array<i64: 1, 128>}, {pipeline_mode = #tpu.pipeline_mode<synchronous>, transform_indices = @transform_14, window_bounds = array<i64: 128, 128>}, {pipeline_mode = #tpu.pipeline_mode<synchronous>, transform_indices = @transform_15, window_bounds = array<i64: 1, 128>}, {pipeline_mode = #tpu.pipeline_mode<synchronous>, transform_indices = @transform_16, window_bounds = array<i64: 128, 128>}, {pipeline_mode = #tpu.pipeline_mode<synchronous>, transform_indices = @transform_17, window_bounds = array<i64: 1, 128>}, {pipeline_mode = #tpu.pipeline_mode<synchronous>, transform_indices = @transform_18, window_bounds = array<i64: 128, 256>}, {pipeline_mode = #tpu.pipeline_mode<synchronous>, transform_indices = @transform_19, window_bounds = array<i64: 1, 256>}, {transform_indices = @transform_20, window_bounds = array<i64: 8, 256>}, {transform_indices = @transform_21, window_bounds = array<i64: 8, 128>}, {transform_indices = @transform_22, window_bounds = array<i64: 8, 128>}, {transform_indices = @transform_23, window_bounds = array<i64: 8, 128>}, {transform_indices = @transform_24, window_bounds = array<i64: 8, 128>}, {transform_indices = @transform_25, window_bounds = array<i64: 8, 128>}]} {
    %c0 = arith.constant 0 : index
    %c0_0 = arith.constant 0 : index
    %0 = vector.load %arg1[%c0, %c0_0] : memref<8x128xf32, #tpu.memory_space<vmem>>, vector<8x128xf32>
    %c0_1 = arith.constant 0 : index
    %c0_2 = arith.constant 0 : index
    %1 = vector.load %arg3[%c0_1, %c0_2] : memref<128x128xf32, #tpu.memory_space<vmem>>, vector<128x128xf32>
    %cst = arith.constant dense<0.000000e+00> : vector<8x128xf32>
    %2 = tpu.matmul %0, %1, %cst {dimension_numbers = #tpu.dot_dimension_numbers<[1], [0], [0], [1], [0, 0, 1, 1], [], []>} : vector<8x128xf32>, vector<128x128xf32>, vector<8x128xf32> -> vector<8x128xf32>
    %c0_3 = arith.constant 0 : index
    %c0_4 = arith.constant 0 : index
    %3 = vector.load %arg4[%c0_3, %c0_4] : memref<1x128xf32, #tpu.memory_space<vmem>>, vector<1x128xf32>
    %4 = vector.broadcast %3 : vector<1x128xf32> to vector<8x128xf32>
    %5 = arith.addf %2, %4 : vector<8x128xf32>
    %cst_5 = arith.constant 0.000000e+00 : f32
    %6 = vector.broadcast %cst_5 : f32 to vector<8x128xf32>
    %7 = arith.maximumf %5, %6 : vector<8x128xf32>
    %c0_6 = arith.constant 0 : index
    %c0_7 = arith.constant 0 : index
    %8 = vector.load %arg5[%c0_6, %c0_7] : memref<128x64xf32, #tpu.memory_space<vmem>>, vector<128x64xf32>
    %cst_8 = arith.constant dense<0.000000e+00> : vector<8x64xf32>
    %9 = tpu.matmul %7, %8, %cst_8 {dimension_numbers = #tpu.dot_dimension_numbers<[1], [0], [0], [1], [0, 0, 1, 1], [], []>} : vector<8x128xf32>, vector<128x64xf32>, vector<8x64xf32> -> vector<8x64xf32>
    %c0_9 = arith.constant 0 : index
    %c0_10 = arith.constant 0 : index
    %10 = vector.load %arg6[%c0_9, %c0_10] : memref<1x64xf32, #tpu.memory_space<vmem>>, vector<1x64xf32>
    %11 = vector.broadcast %10 : vector<1x64xf32> to vector<8x64xf32>
    %12 = arith.addf %9, %11 : vector<8x64xf32>
    %cst_11 = arith.constant 0.000000e+00 : f32
    %13 = vector.broadcast %cst_11 : f32 to vector<8x64xf32>
    %14 = arith.maximumf %12, %13 : vector<8x64xf32>
    %c0_12 = arith.constant 0 : index
    %c0_13 = arith.constant 0 : index
    %15 = vector.load %arg7[%c0_12, %c0_13] : memref<64x256xf32, #tpu.memory_space<vmem>>, vector<64x256xf32>
    %cst_14 = arith.constant dense<0.000000e+00> : vector<8x256xf32>
    %16 = tpu.matmul %14, %15, %cst_14 {dimension_numbers = #tpu.dot_dimension_numbers<[1], [0], [0], [1], [0, 0, 1, 1], [], []>} : vector<8x64xf32>, vector<64x256xf32>, vector<8x256xf32> -> vector<8x256xf32>
    %c0_15 = arith.constant 0 : index
    %c0_16 = arith.constant 0 : index
    %17 = vector.load %arg8[%c0_15, %c0_16] : memref<1x256xf32, #tpu.memory_space<vmem>>, vector<1x256xf32>
    %18 = vector.broadcast %17 : vector<1x256xf32> to vector<8x256xf32>
    %19 = arith.addf %16, %18 : vector<8x256xf32>
    %c0_17 = arith.constant 0 : index
    %c0_18 = arith.constant 0 : index
    %20 = vector.load %arg21[%c0_17, %c0_18] : memref<8x256xf32, #tpu.memory_space<vmem>>, vector<8x256xf32>
    tpu.vector_store %arg21[%c0_17, %c0_18], %19 {strides = array<i32>} : memref<8x256xf32, #tpu.memory_space<vmem>>, vector<8x256xf32>,
    %21 = vector.extract_strided_slice %19 {offsets = [0, 0], sizes = [8, 128], strides = [1, 1]} : vector<8x256xf32> to vector<8x128xf32>
    %22 = vector.extract_strided_slice %19 {offsets = [0, 128], sizes = [8, 128], strides = [1, 1]} : vector<8x256xf32> to vector<8x128xf32>
    %cst_19 = arith.constant 5.000000e-01 : f32
    %23 = vector.broadcast %cst_19 : f32 to vector<8x128xf32>
    %24 = arith.mulf %23, %22 : vector<8x128xf32>
    %25 = math.exp %24 : vector<8x128xf32>
    %c0_20 = arith.constant 0 : index
    %c0_21 = arith.constant 0 : index
    %26 = vector.load %arg2[%c0_20, %c0_21] : memref<8x256xf32, #tpu.memory_space<vmem>>, vector<8x256xf32>
    %27 = vector.extract_strided_slice %26 {offsets = [0, 0], sizes = [8, 128], strides = [1, 1]} : vector<8x256xf32> to vector<8x128xf32>
    %28 = arith.mulf %27, %25 : vector<8x128xf32>
    %29 = arith.addf %21, %28 : vector<8x128xf32>
    %30 = vector.extract_strided_slice %26 {offsets = [0, 128], sizes = [8, 128], strides = [1, 1]} : vector<8x256xf32> to vector<8x128xf32>
    %31 = arith.mulf %30, %25 : vector<8x128xf32>
    %32 = arith.addf %21, %31 : vector<8x128xf32>
    %c0_22 = arith.constant 0 : index
    %c0_23 = arith.constant 0 : index
    %33 = vector.load %arg9[%c0_22, %c0_23] : memref<128x64xf32, #tpu.memory_space<vmem>>, vector<128x64xf32>
    %cst_24 = arith.constant dense<0.000000e+00> : vector<8x64xf32>
    %34 = tpu.matmul %29, %33, %cst_24 {dimension_numbers = #tpu.dot_dimension_numbers<[1], [0], [0], [1], [0, 0, 1, 1], [], []>} : vector<8x128xf32>, vector<128x64xf32>, vector<8x64xf32> -> vector<8x64xf32>
    %c0_25 = arith.constant 0 : index
    %c0_26 = arith.constant 0 : index
    %35 = vector.load %arg10[%c0_25, %c0_26] : memref<1x64xf32, #tpu.memory_space<vmem>>, vector<1x64xf32>
    %36 = vector.broadcast %35 : vector<1x64xf32> to vector<8x64xf32>
    %37 = arith.addf %34, %36 : vector<8x64xf32>
    %cst_27 = arith.constant 0.000000e+00 : f32
    %38 = vector.broadcast %cst_27 : f32 to vector<8x64xf32>
    %39 = arith.maximumf %37, %38 : vector<8x64xf32>
    %c0_28 = arith.constant 0 : index
    %c0_29 = arith.constant 0 : index
    %40 = vector.load %arg11[%c0_28, %c0_29] : memref<64x128xf32, #tpu.memory_space<vmem>>, vector<64x128xf32>
    %cst_30 = arith.constant dense<0.000000e+00> : vector<8x128xf32>
    %41 = tpu.matmul %39, %40, %cst_30 {dimension_numbers = #tpu.dot_dimension_numbers<[1], [0], [0], [1], [0, 0, 1, 1], [], []>} : vector<8x64xf32>, vector<64x128xf32>, vector<8x128xf32> -> vector<8x128xf32>
    %c0_31 = arith.constant 0 : index
    %c0_32 = arith.constant 0 : index
    %42 = vector.load %arg12[%c0_31, %c0_32] : memref<1x128xf32, #tpu.memory_space<vmem>>, vector<1x128xf32>
    %43 = vector.broadcast %42 : vector<1x128xf32> to vector<8x128xf32>
    %44 = arith.addf %41, %43 : vector<8x128xf32>
    %cst_33 = arith.constant 0.000000e+00 : f32
    %45 = vector.broadcast %cst_33 : f32 to vector<8x128xf32>
    %46 = arith.maximumf %44, %45 : vector<8x128xf32>
    %c0_34 = arith.constant 0 : index
    %c0_35 = arith.constant 0 : index
    %47 = vector.load %arg13[%c0_34, %c0_35] : memref<128x128xf32, #tpu.memory_space<vmem>>, vector<128x128xf32>
    %cst_36 = arith.constant dense<0.000000e+00> : vector<8x128xf32>
    %48 = tpu.matmul %46, %47, %cst_36 {dimension_numbers = #tpu.dot_dimension_numbers<[1], [0], [0], [1], [0, 0, 1, 1], [], []>} : vector<8x128xf32>, vector<128x128xf32>, vector<8x128xf32> -> vector<8x128xf32>
    %c0_37 = arith.constant 0 : index
    %c0_38 = arith.constant 0 : index
    %49 = vector.load %arg14[%c0_37, %c0_38] : memref<1x128xf32, #tpu.memory_space<vmem>>, vector<1x128xf32>
    %50 = vector.broadcast %49 : vector<1x128xf32> to vector<8x128xf32>
    %51 = arith.addf %48, %50 : vector<8x128xf32>
    %52 = math.exp %51 : vector<8x128xf32>
    %cst_39 = arith.constant 9.99999974E-6 : f32
    %cst_40 = arith.constant 1.000000e+06 : f32
    %53 = vector.broadcast %cst_39 : f32 to vector<8x128xf32>
    %54 = arith.maximumf %53, %52 : vector<8x128xf32>
    %55 = vector.broadcast %cst_40 : f32 to vector<8x128xf32>
    %56 = arith.minimumf %55, %54 : vector<8x128xf32>
    %c0_41 = arith.constant 0 : index
    %c0_42 = arith.constant 0 : index
    %57 = vector.load %arg22[%c0_41, %c0_42] : memref<8x128xf32, #tpu.memory_space<vmem>>, vector<8x128xf32>
    tpu.vector_store %arg22[%c0_41, %c0_42], %56 {strides = array<i32>} : memref<8x128xf32, #tpu.memory_space<vmem>>, vector<8x128xf32>,
    %c0_43 = arith.constant 0 : index
    %c0_44 = arith.constant 0 : index
    %58 = vector.load %arg15[%c0_43, %c0_44] : memref<128x128xf32, #tpu.memory_space<vmem>>, vector<128x128xf32>
    %cst_45 = arith.constant dense<0.000000e+00> : vector<8x128xf32>
    %59 = tpu.matmul %46, %58, %cst_45 {dimension_numbers = #tpu.dot_dimension_numbers<[1], [0], [0], [1], [0, 0, 1, 1], [], []>} : vector<8x128xf32>, vector<128x128xf32>, vector<8x128xf32> -> vector<8x128xf32>
    %c0_46 = arith.constant 0 : index
    %c0_47 = arith.constant 0 : index
    %60 = vector.load %arg16[%c0_46, %c0_47] : memref<1x128xf32, #tpu.memory_space<vmem>>, vector<1x128xf32>
    %61 = vector.broadcast %60 : vector<1x128xf32> to vector<8x128xf32>
    %62 = arith.addf %59, %61 : vector<8x128xf32>
    %cst_48 = arith.constant 2.000000e+01 : f32
    %63 = vector.broadcast %cst_48 : f32 to vector<8x128xf32>
    %64 = arith.cmpf ogt, %62, %63 : vector<8x128xf32>
    %cst_49 = arith.constant 2.000000e+01 : f32
    %65 = vector.broadcast %cst_49 : f32 to vector<8x128xf32>
    %66 = arith.minimumf %62, %65 : vector<8x128xf32>
    %67 = math.exp %66 : vector<8x128xf32>
    %cst_50 = arith.constant 1.000000e+00 : f32
    %68 = vector.broadcast %cst_50 : f32 to vector<8x128xf32>
    %69 = arith.addf %68, %67 : vector<8x128xf32>
    %70 = math.log %69 : vector<8x128xf32>
    %71 = arith.select %64, %62, %70 : vector<8x128xi1>, vector<8x128xf32>
    %cst_51 = arith.constant 9.99999974E-5 : f32
    %cst_52 = arith.constant 1.000000e+04 : f32
    %72 = vector.broadcast %cst_51 : f32 to vector<8x128xf32>
    %73 = arith.maximumf %72, %71 : vector<8x128xf32>
    %74 = vector.broadcast %cst_52 : f32 to vector<8x128xf32>
    %75 = arith.minimumf %74, %73 : vector<8x128xf32>
    %c0_53 = arith.constant 0 : index
    %c0_54 = arith.constant 0 : index
    %76 = vector.load %arg23[%c0_53, %c0_54] : memref<8x128xf32, #tpu.memory_space<vmem>>, vector<8x128xf32>
    tpu.vector_store %arg23[%c0_53, %c0_54], %75 {strides = array<i32>} : memref<8x128xf32, #tpu.memory_space<vmem>>, vector<8x128xf32>,
    %c0_55 = arith.constant 0 : index
    %c0_56 = arith.constant 0 : index
    %77 = vector.load %arg17[%c0_55, %c0_56] : memref<128x128xf32, #tpu.memory_space<vmem>>, vector<128x128xf32>
    %cst_57 = arith.constant dense<0.000000e+00> : vector<8x128xf32>
    %78 = tpu.matmul %46, %77, %cst_57 {dimension_numbers = #tpu.dot_dimension_numbers<[1], [0], [0], [1], [0, 0, 1, 1], [], []>} : vector<8x128xf32>, vector<128x128xf32>, vector<8x128xf32> -> vector<8x128xf32>
    %c0_58 = arith.constant 0 : index
    %c0_59 = arith.constant 0 : index
    %79 = vector.load %arg18[%c0_58, %c0_59] : memref<1x128xf32, #tpu.memory_space<vmem>>, vector<1x128xf32>
    %80 = vector.broadcast %79 : vector<1x128xf32> to vector<8x128xf32>
    %81 = arith.addf %78, %80 : vector<8x128xf32>
    %cst_60 = arith.constant 5.000000e-01 : f32
    %82 = vector.broadcast %cst_60 : f32 to vector<8x128xf32>
    %83 = arith.mulf %82, %81 : vector<8x128xf32>
    %84 = math.tanh %83 : vector<8x128xf32>
    %cst_61 = arith.constant 1.000000e+00 : f32
    %85 = vector.broadcast %cst_61 : f32 to vector<8x128xf32>
    %86 = arith.addf %84, %85 : vector<8x128xf32>
    %cst_62 = arith.constant 5.000000e-01 : f32
    %87 = vector.broadcast %cst_62 : f32 to vector<8x128xf32>
    %88 = arith.mulf %87, %86 : vector<8x128xf32>
    %c0_63 = arith.constant 0 : index
    %c0_64 = arith.constant 0 : index
    %89 = vector.load %arg24[%c0_63, %c0_64] : memref<8x128xf32, #tpu.memory_space<vmem>>, vector<8x128xf32>
    tpu.vector_store %arg24[%c0_63, %c0_64], %88 {strides = array<i32>} : memref<8x128xf32, #tpu.memory_space<vmem>>, vector<8x128xf32>,
    %c0_65 = arith.constant 0 : index
    %c0_66 = arith.constant 0 : index
    %90 = vector.load %arg19[%c0_65, %c0_66] : memref<128x256xf32, #tpu.memory_space<vmem>>, vector<128x256xf32>
    %cst_67 = arith.constant dense<0.000000e+00> : vector<8x256xf32>
    %91 = tpu.matmul %32, %90, %cst_67 {dimension_numbers = #tpu.dot_dimension_numbers<[1], [0], [0], [1], [0, 0, 1, 1], [], []>} : vector<8x128xf32>, vector<128x256xf32>, vector<8x256xf32> -> vector<8x256xf32>
    %c0_68 = arith.constant 0 : index
    %c0_69 = arith.constant 0 : index
    %92 = vector.load %arg20[%c0_68, %c0_69] : memref<1x256xf32, #tpu.memory_space<vmem>>, vector<1x256xf32>
    %93 = vector.broadcast %92 : vector<1x256xf32> to vector<8x256xf32>
    %94 = arith.addf %91, %93 : vector<8x256xf32>
    %95 = vector.extract_strided_slice %94 {offsets = [0, 0], sizes = [8, 128], strides = [1, 1]} : vector<8x256xf32> to vector<8x128xf32>
    %96 = vector.extract_strided_slice %94 {offsets = [0, 128], sizes = [8, 128], strides = [1, 1]} : vector<8x256xf32> to vector<8x128xf32>
    %97 = arith.mulf %32, %32 : vector<8x128xf32>
    %cst_70 = arith.constant dense<0.000000e+00> : vector<8xf32>
    %98 = vector.multi_reduction <add>, %97, %cst_70 [1] : vector<8x128xf32> to vector<8xf32>
    %99 = vector.shape_cast %98 : vector<8xf32> to vector<8x1xf32>
    %100 = vector.broadcast %99 : vector<8x1xf32> to vector<8x128xf32>
    %101 = arith.addf %100, %95 : vector<8x128xf32>
    %cst_71 = arith.constant 0.000000e+00 : f32
    %102 = vector.broadcast %cst_71 : f32 to vector<8x128xf32>
    %103 = arith.maximumf %101, %102 : vector<8x128xf32>
    %cst_72 = arith.constant 1.000000e+00 : f32
    %104 = vector.broadcast %cst_72 : f32 to vector<8x128xf32>
    %105 = arith.addf %104, %103 : vector<8x128xf32>
    %106 = tpu.reciprocal %105 {approx = true} : vector<8x128xf32> -> vector<8x128xf32>
    %cst_73 = arith.constant dense<0.000000e+00> : vector<8xf32>
    %107 = vector.multi_reduction <add>, %106, %cst_73 [1] : vector<8x128xf32> to vector<8xf32>
    %108 = vector.shape_cast %107 : vector<8xf32> to vector<8x1xf32>
    %109 = tpu.reciprocal %108 {approx = true} : vector<8x1xf32> -> vector<8x1xf32>
    %110 = vector.broadcast %109 : vector<8x1xf32> to vector<8x128xf32>
    %111 = arith.mulf %106, %110 : vector<8x128xf32>
    %c0_74 = arith.constant 0 : index
    %c0_75 = arith.constant 0 : index
    %112 = vector.load %arg25[%c0_74, %c0_75] : memref<8x128xf32, #tpu.memory_space<vmem>>, vector<8x128xf32>
    tpu.vector_store %arg25[%c0_74, %c0_75], %111 {strides = array<i32>} : memref<8x128xf32, #tpu.memory_space<vmem>>, vector<8x128xf32>,
    %cst_76 = arith.constant 0.000000e+00 : f32
    %113 = vector.broadcast %cst_76 : f32 to vector<8x128xf32>
    %114 = arith.maximumf %96, %113 : vector<8x128xf32>
    %c0_77 = arith.constant 0 : index
    %c0_78 = arith.constant 0 : index
    %115 = vector.load %arg26[%c0_77, %c0_78] : memref<8x128xf32, #tpu.memory_space<vmem>>, vector<8x128xf32>
    tpu.vector_store %arg26[%c0_77, %c0_78], %114 {strides = array<i32>} : memref<8x128xf32, #tpu.memory_space<vmem>>, vector<8x128xf32>,
    return
  }
  func.func @transform_0(%arg0: i32) -> (i32, i32) {
    %c0_i32 = arith.constant 0 : i32
    %c0_i32_0 = arith.constant 0 : i32
    return %arg0, %c0_i32 : i32, i32
  }
  func.func @transform_1(%arg0: i32) -> (i32, i32) {
    %c0_i32 = arith.constant 0 : i32
    %c0_i32_0 = arith.constant 0 : i32
    return %arg0, %c0_i32 : i32, i32
  }
  func.func @transform_2(%arg0: i32) -> (i32, i32) {
    %c0_i32 = arith.constant 0 : i32
    %c0_i32_0 = arith.constant 0 : i32
    %c0_i32_1 = arith.constant 0 : i32
    return %c0_i32, %c0_i32_0 : i32, i32
  }
  func.func @transform_3(%arg0: i32) -> (i32, i32) {
    %c0_i32 = arith.constant 0 : i32
    %c0_i32_0 = arith.constant 0 : i32
    %c0_i32_1 = arith.constant 0 : i32
    return %c0_i32, %c0_i32_0 : i32, i32
  }
  func.func @transform_4(%arg0: i32) -> (i32, i32) {
    %c0_i32 = arith.constant 0 : i32
    %c0_i32_0 = arith.constant 0 : i32
    %c0_i32_1 = arith.constant 0 : i32
    return %c0_i32, %c0_i32_0 : i32, i32
  }
  func.func @transform_5(%arg0: i32) -> (i32, i32) {
    %c0_i32 = arith.constant 0 : i32
    %c0_i32_0 = arith.constant 0 : i32
    %c0_i32_1 = arith.constant 0 : i32
    return %c0_i32, %c0_i32_0 : i32, i32
  }
  func.func @transform_6(%arg0: i32) -> (i32, i32) {
    %c0_i32 = arith.constant 0 : i32
    %c0_i32_0 = arith.constant 0 : i32
    %c0_i32_1 = arith.constant 0 : i32
    return %c0_i32, %c0_i32_0 : i32, i32
  }
  func.func @transform_7(%arg0: i32) -> (i32, i32) {
    %c0_i32 = arith.constant 0 : i32
    %c0_i32_0 = arith.constant 0 : i32
    %c0_i32_1 = arith.constant 0 : i32
    return %c0_i32, %c0_i32_0 : i32, i32
  }
  func.func @transform_8(%arg0: i32) -> (i32, i32) {
    %c0_i32 = arith.constant 0 : i32
    %c0_i32_0 = arith.constant 0 : i32
    %c0_i32_1 = arith.constant 0 : i32
    return %c0_i32, %c0_i32_0 : i32, i32
  }
  func.func @transform_9(%arg0: i32) -> (i32, i32) {
    %c0_i32 = arith.constant 0 : i32
    %c0_i32_0 = arith.constant 0 : i32
    %c0_i32_1 = arith.constant 0 : i32
    return %c0_i32, %c0_i32_0 : i32, i32
  }
  func.func @transform_10(%arg0: i32) -> (i32, i32) {
    %c0_i32 = arith.constant 0 : i32
    %c0_i32_0 = arith.constant 0 : i32
    %c0_i32_1 = arith.constant 0 : i32
    return %c0_i32, %c0_i32_0 : i32, i32
  }
  func.func @transform_11(%arg0: i32) -> (i32, i32) {
    %c0_i32 = arith.constant 0 : i32
    %c0_i32_0 = arith.constant 0 : i32
    %c0_i32_1 = arith.constant 0 : i32
    return %c0_i32, %c0_i32_0 : i32, i32
  }
  func.func @transform_12(%arg0: i32) -> (i32, i32) {
    %c0_i32 = arith.constant 0 : i32
    %c0_i32_0 = arith.constant 0 : i32
    %c0_i32_1 = arith.constant 0 : i32
    return %c0_i32, %c0_i32_0 : i32, i32
  }
  func.func @transform_13(%arg0: i32) -> (i32, i32) {
    %c0_i32 = arith.constant 0 : i32
    %c0_i32_0 = arith.constant 0 : i32
    %c0_i32_1 = arith.constant 0 : i32
    return %c0_i32, %c0_i32_0 : i32, i32
  }
  func.func @transform_14(%arg0: i32) -> (i32, i32) {
    %c0_i32 = arith.constant 0 : i32
    %c0_i32_0 = arith.constant 0 : i32
    %c0_i32_1 = arith.constant 0 : i32
    return %c0_i32, %c0_i32_0 : i32, i32
  }
  func.func @transform_15(%arg0: i32) -> (i32, i32) {
    %c0_i32 = arith.constant 0 : i32
    %c0_i32_0 = arith.constant 0 : i32
    %c0_i32_1 = arith.constant 0 : i32
    return %c0_i32, %c0_i32_0 : i32, i32
  }
  func.func @transform_16(%arg0: i32) -> (i32, i32) {
    %c0_i32 = arith.constant 0 : i32
    %c0_i32_0 = arith.constant 0 : i32
    %c0_i32_1 = arith.constant 0 : i32
    return %c0_i32, %c0_i32_0 : i32, i32
  }
  func.func @transform_17(%arg0: i32) -> (i32, i32) {
    %c0_i32 = arith.constant 0 : i32
    %c0_i32_0 = arith.constant 0 : i32
    %c0_i32_1 = arith.constant 0 : i32
    return %c0_i32, %c0_i32_0 : i32, i32
  }
  func.func @transform_18(%arg0: i32) -> (i32, i32) {
    %c0_i32 = arith.constant 0 : i32
    %c0_i32_0 = arith.constant 0 : i32
    %c0_i32_1 = arith.constant 0 : i32
    return %c0_i32, %c0_i32_0 : i32, i32
  }
  func.func @transform_19(%arg0: i32) -> (i32, i32) {
    %c0_i32 = arith.constant 0 : i32
    %c0_i32_0 = arith.constant 0 : i32
    %c0_i32_1 = arith.constant 0 : i32
    return %c0_i32, %c0_i32_0 : i32, i32
  }
  func.func @transform_20(%arg0: i32) -> (i32, i32) {
    %c0_i32 = arith.constant 0 : i32
    %c0_i32_0 = arith.constant 0 : i32
    return %arg0, %c0_i32 : i32, i32
  }
  func.func @transform_21(%arg0: i32) -> (i32, i32) {
    %c0_i32 = arith.constant 0 : i32
    %c0_i32_0 = arith.constant 0 : i32
    return %arg0, %c0_i32 : i32, i32
  }
  func.func @transform_22(%arg0: i32) -> (i32, i32) {
    %c0_i32 = arith.constant 0 : i32
    %c0_i32_0 = arith.constant 0 : i32
    return %arg0, %c0_i32 : i32, i32
  }
  func.func @transform_23(%arg0: i32) -> (i32, i32) {
    %c0_i32 = arith.constant 0 : i32
    %c0_i32_0 = arith.constant 0 : i32
    return %arg0, %c0_i32 : i32, i32
  }
  func.func @transform_24(%arg0: i32) -> (i32, i32) {
    %c0_i32 = arith.constant 0 : i32
    %c0_i32_0 = arith.constant 0 : i32
    return %arg0, %c0_i32 : i32, i32
  }
  func.func @transform_25(%arg0: i32) -> (i32, i32) {
    %c0_i32 = arith.constant 0 : i32
    %c0_i32_0 = arith.constant 0 : i32
    return %arg0, %c0_i32 : i32, i32
  }
}

</mosaic_0001>

<bundles_post_ra>
// kernel: tpu_custom_call.1
= control target key start
LH: loop header
LB: loop body
LE: loop exit
PB: predicated region body
PF: predicated region fallthrough
CT: control target
= control target key end

     0   :  { %s3043_s0 = inlined_call_operand.hbm [shape: f32[8,128], index: 0, kind: input, shape index: {}]   ;;  %s3044_s1 = inlined_call_operand.hbm [shape: f32[8,256], index: 1, kind: input, shape index: {}]   ;;  %s3045_s2 = inlined_call_operand.vmem [shape: f32[128,128], index: 2, kind: input, shape index: {}]   ;;  %s3046_s3 = inlined_call_operand.hbm [shape: f32[1,128], index: 3, kind: input, shape index: {}]   ;;  %s3047_s4 = inlined_call_operand.vmem [shape: f32[128,64], index: 4, kind: input, shape index: {}]   ;;  %s3048_s5 = inlined_call_operand.hbm [shape: f32[1,64], index: 5, kind: input, shape index: {}]   ;;  %s3049_s6 = inlined_call_operand.hbm [shape: f32[64,256], index: 6, kind: input, shape index: {}]   ;;  %s3050_s7 = inlined_call_operand.vmem [shape: f32[1,256], index: 7, kind: input, shape index: {}]   ;;  %s3051_s8 = inlined_call_operand.vmem [shape: f32[128,64], index: 8, kind: input, shape index: {}]   ;;  %s3052_s9 = inlined_call_operand.hbm [shape: f32[1,64], index: 9, kind: input, shape index: {}]   ;;  %s3053_s10 = inlined_call_operand.vmem [shape: f32[64,128], index: 10, kind: input, shape index: {}]   ;;  %s3054_s11 = inlined_call_operand.hbm [shape: f32[1,128], index: 11, kind: input, shape index: {}]   ;;  %s3055_s12 = inlined_call_operand.hbm [shape: f32[128,128], index: 12, kind: input, shape index: {}]   ;;  %s3056_s13 = inlined_call_operand.hbm [shape: f32[1,128], index: 13, kind: input, shape index: {}]   ;;  %s3057_s14 = inlined_call_operand.hbm [shape: f32[128,128], index: 14, kind: input, shape index: {}]   ;;  %s3058_s15 = inlined_call_operand.hbm [shape: f32[1,128], index: 15, kind: input, shape index: {}]   ;;  %s3059_s16 = inlined_call_operand.hbm [shape: f32[128,128], index: 16, kind: input, shape index: {}]   ;;  %s3060_s17 = inlined_call_operand.hbm [shape: f32[1,128], index: 17, kind: input, shape index: {}]   ;;  %s3061_s18 = inlined_call_operand.vmem [shape: f32[128,256], index: 18, kind: input, shape index: {}]   ;;  %s3062_s19 = inlined_call_operand.vmem [shape: f32[1,256], index: 19, kind: input, shape index: {}]   ;;  %s3063_s20 = inlined_call_operand.hbm [shape: f32[8,256], index: 20, kind: output, shape index: {0}]   ;;  %s3064_s21 = inlined_call_operand.hbm [shape: f32[8,128], index: 21, kind: output, shape index: {1}]   ;;  %s3065_s22 = inlined_call_operand.hbm [shape: f32[8,128], index: 22, kind: output, shape index: {2}]   ;;  %s3066_s23 = inlined_call_operand.hbm [shape: f32[8,128], index: 23, kind: output, shape index: {3}]   ;;  %s3067_s24 = inlined_call_operand.hbm [shape: f32[8,128], index: 24, kind: output, shape index: {4}]   ;;  %s3068_s25 = inlined_call_operand.hbm [shape: f32[8,128], index: 25, kind: output, shape index: {5}]  }
   0x1   :  { %3079 = sst [smem:[#allocation43_spill]] %s3043_s0 }
   0x2   :  { %3080 = sst [smem:[#allocation44_spill]] %s3044_s1 }
   0x3   :  { %3081 = sst [smem:[#allocation45_spill]] %s3045_s2 }
   0x4   :  { %3082 = sst [smem:[#allocation46_spill]] %s3046_s3 }
   0x5   :  { %3083 = sst [smem:[#allocation47_spill]] %s3047_s4 }
   0x6   :  { %3084 = sst [smem:[#allocation48_spill]] %s3048_s5 }
   0x7   :  { %3085 = sst [smem:[#allocation49_spill]] %s3049_s6 }
   0x8   :  { %3086 = sst [smem:[#allocation50_spill]] %s3050_s7 }
   0x9   :  { %3087 = sst [smem:[#allocation51_spill]] %s3051_s8 }
   0xa   :  { %3088 = sst [smem:[#allocation52_spill]] %s3052_s9 }
   0xb   :  { %3089 = sst [smem:[#allocation53_spill]] %s3067_s24 }
   0xc   :  { %31 = vsyncpa [#allocation3], 0 }
   0xd   :  { %32 = vsyncpa [#allocation6], 0 }
   0xe   :  { %33 = vsyncpa [#allocation9], 0 }
   0xf   :  { %34 = vsyncpa [#allocation12], 0 }
  0x10   :  { %35 = vsyncpa [#allocation15], 0 }
  0x11   :  { %36 = vsyncpa [#allocation18], 0 }
  0x12   :  { %37 = vsyncpa [#allocation21], 0 }
  0x13   :  { %38 = vsyncpa [#allocation4], 0 }
  0x14   :  { %39 = vsyncpa [#allocation25], 0 }
  0x15   :  { %40 = vsyncpa [#allocation28], 0 }
  0x16   :  { %41 = vsyncpa [#allocation31], 0  ;;  %s2270_s29 = smov [#allocation5]   ;;  %s2271_s6 = smov [#allocation8]  }
  0x17   :  { %s58_s2 = sshll.u32 %s2270_s29, 4  ;;  %s82_s30 = sshll.u32 %s2271_s6, 4  ;;  %s59_s2 = int_to_ptr.vmem [resolvable:$true] %s58_s2  ;;  %s83_s30 = int_to_ptr.vmem [resolvable:$true] %s82_s30 }
  0x18   :  { %s3090_s26 = sld [smem:[#allocation44_spill]] }
  0x1e   :  { %s1830_s1 = scalar_lea.hbm %s3090_s26, 256 }
  0x1f   :  { %p1831_p0 = scmp.ne.s32.totalorder %s3090_s26, %s1830_s1  ;;  %p1834_p1 = scmp.lt.u32.totalorder %s1830_s1, %s3090_s26 }
  0x21   :  { %p1836_p2 = pnand %p1834_p1, %p1831_p0 }
  0x23   :  { %1839 = shalt.err (!%p1836_p2)
}
  0x24   :  { %s1840_s9 = scalar_lea.vmem %s59_s2, 256  ;;  %p1845_p4 = scmp.lt.s32.totalorder %s59_s2, %s59_s2 }
  0x25   :  { %p1841_p3 = scmp.ne.s32.totalorder %s59_s2, %s1840_s9  ;;  %p1846_p5 = scmp.lt.s32.totalorder %s1840_s9, %s1840_s9 }
  0x27   :  { %p1847_p6 = por %p1846_p5, %p1845_p4 }
  0x29   :  { %p1848_p7 = pnand %p1847_p6, %p1841_p3 }
  0x2b   :  { %1851 = shalt.err (!%p1848_p7)
}
  0x2c   :  { %61 = dma.hbm_to_vmem [thread:$0]  %s3090_s26, 256, %s59_s2, [#allocation6]  }
  0x2d   :  { %s3091_s7 = sld [smem:[#allocation48_spill]] }
  0x33   :  { %s1852_s3 = scalar_lea.hbm %s3091_s7, 16 }
  0x34   :  { %p1853_p8 = scmp.ne.s32.totalorder %s3091_s7, %s1852_s3  ;;  %p1856_p9 = scmp.lt.u32.totalorder %s1852_s3, %s3091_s7 }
  0x36   :  { %p1858_p10 = pnand %p1856_p9, %p1853_p8 }
  0x38   :  { %1861 = shalt.err (!%p1858_p10)
}
  0x39   :  { %s1862_s28 = scalar_lea.vmem %s83_s30, 16  ;;  %s1866_s9 = scalar_lea.vmem %s83_s30, 32 }
  0x3a   :  { %p1863_p11 = scmp.ne.s32.totalorder %s83_s30, %s1862_s28  ;;  %p1867_p12 = scmp.lt.s32.totalorder %s83_s30, %s83_s30 }
  0x3b   :  { %p1868_p13 = scmp.lt.s32.totalorder %s1866_s9, %s1862_s28 }
  0x3d   :  { %p1869_p0 = por %p1868_p13, %p1867_p12 }
  0x3f   :  { %p1870_p1 = pnand %p1869_p0, %p1863_p11 }
  0x41   :  { %1873 = shalt.err (!%p1870_p1)
}
  0x42   :  { %85 = dma.hbm_to_vmem [thread:$0]  %s3091_s7, 16, %s83_s30, [#allocation9]  }
  0x43   :  { %s2272_s5 = smov [#allocation11]   ;;  %s2273_s29 = smov [#allocation14]  }
  0x44   :  { %s108_s0 = sshll.u32 %s2272_s5, 4  ;;  %s129_s6 = sshll.u32 %s2273_s29, 4  ;;  %s109_s0 = int_to_ptr.vmem [resolvable:$true] %s108_s0  ;;  %s2450_s6 = int_to_ptr.vmem [resolvable:$true] %s129_s6 }
  0x45   :  { %s3092_s27 = sld [smem:[#allocation52_spill]] }
  0x4b   :  { %s1874_s1 = scalar_lea.hbm %s3092_s27, 16 }
  0x4c   :  { %p1875_p2 = scmp.ne.s32.totalorder %s3092_s27, %s1874_s1  ;;  %p1878_p3 = scmp.lt.u32.totalorder %s1874_s1, %s3092_s27 }
  0x4e   :  { %p1880_p4 = pnand %p1878_p3, %p1875_p2 }
  0x50   :  { %1883 = shalt.err (!%p1880_p4)
}
  0x51   :  { %s1884_s30 = scalar_lea.vmem %s109_s0, 16  ;;  %s1888_s7 = scalar_lea.vmem %s109_s0, 32 }
  0x52   :  { %p1885_p5 = scmp.ne.s32.totalorder %s109_s0, %s1884_s30  ;;  %p1889_p6 = scmp.lt.s32.totalorder %s109_s0, %s109_s0 }
  0x53   :  { %p1890_p7 = scmp.lt.s32.totalorder %s1888_s7, %s1884_s30 }
  0x55   :  { %p1891_p8 = por %p1890_p7, %p1889_p6 }
  0x57   :  { %p1892_p9 = pnand %p1891_p8, %p1885_p5 }
  0x59   :  { %1895 = shalt.err (!%p1892_p9)
}
  0x5a   :  { %111 = dma.hbm_to_vmem [thread:$0]  %s3092_s27, 16, %s109_s0, [#allocation12]  }
  0x5b   :  { %s1896_s3 = scalar_lea.hbm %s3055_s12, 2048 }
  0x5c   :  { %p1897_p10 = scmp.ne.s32.totalorder %s3055_s12, %s1896_s3  ;;  %p1900_p11 = scmp.lt.u32.totalorder %s1896_s3, %s3055_s12 }
  0x5e   :  { %p1902_p12 = pnand %p1900_p11, %p1897_p10 }
  0x60   :  { %1905 = shalt.err (!%p1902_p12)
}
  0x61   :  { %s1906_s28 = scalar_lea.vmem %s2450_s6, 2048  ;;  %p1911_p0 = scmp.lt.s32.totalorder %s2450_s6, %s2450_s6 }
  0x62   :  { %p1907_p13 = scmp.ne.s32.totalorder %s2450_s6, %s1906_s28  ;;  %p1912_p1 = scmp.lt.s32.totalorder %s1906_s28, %s1906_s28 }
  0x64   :  { %p1913_p2 = por %p1912_p1, %p1911_p0 }
  0x66   :  { %p1914_p3 = pnand %p1913_p2, %p1907_p13 }
  0x68   :  { %1917 = shalt.err (!%p1914_p3)
}
  0x69   :  { %s2274_s0 = smov 128   ;;  %s2275_s27 = smov 8  }
  0x6a   :  { %135 = dma.hbm_to_vmem [thread:$0]  %s3055_s12, 2048, %s2450_s6, [#allocation15], %s2274_s0, %s2274_s0, %s2275_s27  }
  0x6b   :  { %s2276_s7 = smov [#allocation17]   ;;  %s2277_s26 = smov [#allocation20]  }
  0x6c   :  { %s151_s2 = sshll.u32 %s2276_s7, 4  ;;  %s173_s5 = sshll.u32 %s2277_s26, 4  ;;  %s152_s2 = int_to_ptr.vmem [resolvable:$true] %s151_s2  ;;  %s2484_s5 = int_to_ptr.vmem [resolvable:$true] %s173_s5 }
  0x6d   :  { %s1918_s24 = scalar_lea.hbm %s3057_s14, 2048 }
  0x6e   :  { %p1919_p4 = scmp.ne.s32.totalorder %s3057_s14, %s1918_s24  ;;  %p1922_p5 = scmp.lt.u32.totalorder %s1918_s24, %s3057_s14 }
  0x70   :  { %p1924_p6 = pnand %p1922_p5, %p1919_p4 }
  0x72   :  { %1927 = shalt.err (!%p1924_p6)
}
  0x73   :  { %s1928_s12 = scalar_lea.vmem %s152_s2, 2048  ;;  %p1933_p8 = scmp.lt.s32.totalorder %s152_s2, %s152_s2 }
  0x74   :  { %p1929_p7 = scmp.ne.s32.totalorder %s152_s2, %s1928_s12  ;;  %p1934_p9 = scmp.lt.s32.totalorder %s1928_s12, %s1928_s12 }
  0x76   :  { %p1935_p10 = por %p1934_p9, %p1933_p8 }
  0x78   :  { %p1936_p11 = pnand %p1935_p10, %p1929_p7 }
  0x7a   :  { %1939 = shalt.err (!%p1936_p11)
}
  0x7b   :  { %157 = dma.hbm_to_vmem [thread:$0]  %s3057_s14, 2048, %s152_s2, [#allocation18], %s2274_s0, %s2274_s0, %s2275_s27  }
  0x7c   :  { %s1940_s26 = scalar_lea.hbm %s3059_s16, 2048 }
  0x7d   :  { %p1941_p12 = scmp.ne.s32.totalorder %s3059_s16, %s1940_s26  ;;  %p1944_p13 = scmp.lt.u32.totalorder %s1940_s26, %s3059_s16 }
  0x7f   :  { %p1946_p0 = pnand %p1944_p13, %p1941_p12 }
  0x81   :  { %1949 = shalt.err (!%p1946_p0)
}
  0x82   :  { %s1950_s1 = scalar_lea.vmem %s2484_s5, 2048  ;;  %p1955_p2 = scmp.lt.s32.totalorder %s2484_s5, %s2484_s5 }
  0x83   :  { %p1951_p1 = scmp.ne.s32.totalorder %s2484_s5, %s1950_s1  ;;  %p1956_p3 = scmp.lt.s32.totalorder %s1950_s1, %s1950_s1 }
  0x85   :  { %p1957_p4 = por %p1956_p3, %p1955_p2 }
  0x87   :  { %p1958_p5 = pnand %p1957_p4, %p1951_p1 }
  0x89   :  { %1961 = shalt.err (!%p1958_p5)
}
  0x8a   :  { %179 = dma.hbm_to_vmem [thread:$0]  %s3059_s16, 2048, %s2484_s5, [#allocation21], %s2274_s0, %s2274_s0, %s2275_s27  }
  0x8b   :  { %s2278_s4 = smov [#allocation2]   ;;  %s2279_s12 = smov [#allocation7]  }
  0x8c   :  { %s48_s28 = sshll.u32 %s2278_s4, 4  ;;  %s70_s6 = sshll.u32 %s2279_s12, 4  ;;  %s49_s28 = int_to_ptr.vmem [resolvable:$true] %s48_s28  ;;  %s71_s6 = int_to_ptr.vmem [resolvable:$true] %s70_s6 }
  0x8d   :  { %s3093_s7 = sld [smem:[#allocation43_spill]] }
  0x93   :  { %s1962_s26 = scalar_lea.hbm %s3093_s7, 128 }
  0x94   :  { %p1963_p6 = scmp.ne.s32.totalorder %s3093_s7, %s1962_s26  ;;  %p1966_p7 = scmp.lt.u32.totalorder %s1962_s26, %s3093_s7 }
  0x96   :  { %p1968_p8 = pnand %p1966_p7, %p1963_p6 }
  0x98   :  { %1971 = shalt.err (!%p1968_p8)
}
  0x99   :  { %s1972_s16 = scalar_lea.vmem %s49_s28, 128  ;;  %p1977_p10 = scmp.lt.s32.totalorder %s49_s28, %s49_s28 }
  0x9a   :  { %p1973_p9 = scmp.ne.s32.totalorder %s49_s28, %s1972_s16  ;;  %p1978_p11 = scmp.lt.s32.totalorder %s1972_s16, %s1972_s16 }
  0x9c   :  { %p1979_p12 = por %p1978_p11, %p1977_p10 }
  0x9e   :  { %p1980_p13 = pnand %p1979_p12, %p1973_p9 }
  0xa0   :  { %1983 = shalt.err (!%p1980_p13)
}
  0xa1   :  { %51 = dma.hbm_to_vmem [thread:$0]  %s3093_s7, 128, %s49_s28, [#allocation3]  }
  0xa2   :  { %s3094_s14 = sld [smem:[#allocation46_spill]] }
  0xa8   :  { %s1984_s2 = scalar_lea.hbm %s3094_s14, 16 }
  0xa9   :  { %p1985_p0 = scmp.ne.s32.totalorder %s3094_s14, %s1984_s2  ;;  %p1988_p1 = scmp.lt.u32.totalorder %s1984_s2, %s3094_s14 }
  0xab   :  { %p1990_p2 = pnand %p1988_p1, %p1985_p0 }
  0xad   :  { %1993 = shalt.err (!%p1990_p2)
}
  0xae   :  { %s1994_s26 = scalar_lea.vmem %s71_s6, 16  ;;  %s1998_s29 = scalar_lea.vmem %s71_s6, 32 }
  0xaf   :  { %p1995_p3 = scmp.ne.s32.totalorder %s71_s6, %s1994_s26  ;;  %p1999_p4 = scmp.lt.s32.totalorder %s71_s6, %s71_s6 }
  0xb0   :  { %p2000_p5 = scmp.lt.s32.totalorder %s1998_s29, %s1994_s26 }
  0xb2   :  { %p2001_p6 = por %p2000_p5, %p1999_p4 }
  0xb4   :  { %p2002_p7 = pnand %p2001_p6, %p1995_p3 }
  0xb6   :  { %2005 = shalt.err (!%p2002_p7)
}
  0xb7   :  { %73 = dma.hbm_to_vmem [thread:$0]  %s3094_s14, 16, %s71_s6, [#allocation6]  }
  0xb8   :  { %s2280_s3 = smov [#allocation10]   ;;  %s3095_s0 = sld [smem:[#allocation49_spill]] }
  0xb9   :  { %s91_s24 = sshll.u32 %s2280_s3, 4  ;;  %s92_s24 = int_to_ptr.vmem [resolvable:$true] %s91_s24 }
  0xbe   :  { %s2006_s27 = scalar_lea.hbm %s3095_s0, 2048 }
  0xbf   :  { %p2007_p8 = scmp.ne.s32.totalorder %s3095_s0, %s2006_s27  ;;  %p2010_p9 = scmp.lt.u32.totalorder %s2006_s27, %s3095_s0 }
  0xc1   :  { %p2012_p10 = pnand %p2010_p9, %p2007_p8 }
  0xc3   :  { %2015 = shalt.err (!%p2012_p10)
}
  0xc4   :  { %s2016_s12 = scalar_lea.vmem %s92_s24, 2048  ;;  %p2021_p12 = scmp.lt.s32.totalorder %s92_s24, %s92_s24 }
  0xc5   :  { %p2017_p11 = scmp.ne.s32.totalorder %s92_s24, %s2016_s12  ;;  %p2022_p13 = scmp.lt.s32.totalorder %s2016_s12, %s2016_s12 }
  0xc7   :  { %p2023_p0 = por %p2022_p13, %p2021_p12 }
  0xc9   :  { %p2024_p1 = pnand %p2023_p0, %p2017_p11 }
  0xcb   :  { %2027 = shalt.err (!%p2024_p1)
}
  0xcc   :  { %s2281_s6 = smov 256   ;;  %s2282_s14 = smov 16  }
  0xcd   :  { %97 = dma.hbm_to_vmem [thread:$0]  %s3095_s0, 2048, %s92_s24, [#allocation9], %s2281_s6, %s2281_s6, %s2282_s14  }
  0xce   :  { %s2283_s26 = smov [#allocation13]   ;;  %s2284_s28 = smov [#allocation16]  }
  0xcf   :  { %s120_s29 = sshll.u32 %s2283_s26, 4  ;;  %s142_s7 = sshll.u32 %s2284_s28, 4  ;;  %s121_s29 = int_to_ptr.vmem [resolvable:$true] %s120_s29  ;;  %s143_s7 = int_to_ptr.vmem [resolvable:$true] %s142_s7 }
  0xd0   :  { %s2028_s16 = scalar_lea.hbm %s3054_s11, 16 }
  0xd1   :  { %p2029_p2 = scmp.ne.s32.totalorder %s3054_s11, %s2028_s16  ;;  %p2032_p3 = scmp.lt.u32.totalorder %s2028_s16, %s3054_s11 }
  0xd3   :  { %p2034_p4 = pnand %p2032_p3, %p2029_p2 }
  0xd5   :  { %2037 = shalt.err (!%p2034_p4)
}
  0xd6   :  { %s2038_s24 = scalar_lea.vmem %s121_s29, 16  ;;  %s2042_s0 = scalar_lea.vmem %s121_s29, 32 }
  0xd7   :  { %p2039_p5 = scmp.ne.s32.totalorder %s121_s29, %s2038_s24  ;;  %p2043_p6 = scmp.lt.s32.totalorder %s121_s29, %s121_s29 }
  0xd8   :  { %p2044_p7 = scmp.lt.s32.totalorder %s2042_s0, %s2038_s24 }
  0xda   :  { %p2045_p8 = por %p2044_p7, %p2043_p6 }
  0xdc   :  { %p2046_p9 = pnand %p2045_p8, %p2039_p5 }
  0xde   :  { %2049 = shalt.err (!%p2046_p9)
}
  0xdf   :  { %123 = dma.hbm_to_vmem [thread:$0]  %s3054_s11, 16, %s121_s29, [#allocation12]  }
  0xe0   :  { %s2050_s9 = scalar_lea.hbm %s3056_s13, 16 }
  0xe1   :  { %p2051_p10 = scmp.ne.s32.totalorder %s3056_s13, %s2050_s9  ;;  %p2054_p11 = scmp.lt.u32.totalorder %s2050_s9, %s3056_s13 }
  0xe3   :  { %p2056_p12 = pnand %p2054_p11, %p2051_p10 }
  0xe5   :  { %2059 = shalt.err (!%p2056_p12)
}
  0xe6   :  { %s2060_s8 = scalar_lea.vmem %s143_s7, 16  ;;  %s2064_s16 = scalar_lea.vmem %s143_s7, 32 }
  0xe7   :  { %p2061_p13 = scmp.ne.s32.totalorder %s143_s7, %s2060_s8  ;;  %p2065_p0 = scmp.lt.s32.totalorder %s143_s7, %s143_s7 }
  0xe8   :  { %p2066_p1 = scmp.lt.s32.totalorder %s2064_s16, %s2060_s8 }
  0xea   :  { %p2067_p2 = por %p2066_p1, %p2065_p0 }
  0xec   :  { %p2068_p3 = pnand %p2067_p2, %p2061_p13 }
  0xee   :  { %2071 = shalt.err (!%p2068_p3)
}
  0xef   :  { %145 = dma.hbm_to_vmem [thread:$0]  %s3056_s13, 16, %s143_s7, [#allocation15]  }
  0xf0   :  { %s2285_s27 = smov [#allocation19]   ;;  %s2286_s1 = smov [#allocation22]  }
  0xf1   :  { %s164_s5 = sshll.u32 %s2285_s27, 4  ;;  %s186_s2 = sshll.u32 %s2286_s1, 4  ;;  %s165_s5 = int_to_ptr.vmem [resolvable:$true] %s164_s5  ;;  %s187_s2 = int_to_ptr.vmem [resolvable:$true] %s186_s2 }
  0xf2   :  { %s2072_s4 = scalar_lea.hbm %s3058_s15, 16 }
  0xf3   :  { %p2073_p4 = scmp.ne.s32.totalorder %s3058_s15, %s2072_s4  ;;  %p2076_p5 = scmp.lt.u32.totalorder %s2072_s4, %s3058_s15 }
  0xf5   :  { %p2078_p6 = pnand %p2076_p5, %p2073_p4 }
  0xf7   :  { %2081 = shalt.err (!%p2078_p6)
}
  0xf8   :  { %s2082_s13 = scalar_lea.vmem %s165_s5, 16  ;;  %s2086_s7 = scalar_lea.vmem %s165_s5, 32 }
  0xf9   :  { %p2083_p7 = scmp.ne.s32.totalorder %s165_s5, %s2082_s13  ;;  %p2087_p8 = scmp.lt.s32.totalorder %s165_s5, %s165_s5 }
  0xfa   :  { %p2088_p9 = scmp.lt.s32.totalorder %s2086_s7, %s2082_s13 }
  0xfc   :  { %p2089_p10 = por %p2088_p9, %p2087_p8 }
  0xfe   :  { %p2090_p11 = pnand %p2089_p10, %p2083_p7 }
 0x100   :  { %2093 = shalt.err (!%p2090_p11)
}
 0x101   :  { %167 = dma.hbm_to_vmem [thread:$0]  %s3058_s15, 16, %s165_s5, [#allocation18]  }
 0x102   :  { %s2094_s8 = scalar_lea.hbm %s3060_s17, 16 }
 0x103   :  { %p2095_p12 = scmp.ne.s32.totalorder %s3060_s17, %s2094_s8  ;;  %p2098_p13 = scmp.lt.u32.totalorder %s2094_s8, %s3060_s17 }
 0x105   :  { %p2100_p0 = pnand %p2098_p13, %p2095_p12 }
 0x107   :  { %2103 = shalt.err (!%p2100_p0)
}
 0x108   :  { %s2104_s1 = scalar_lea.vmem %s187_s2, 16  ;;  %s2108_s24 = scalar_lea.vmem %s187_s2, 32 }
 0x109   :  { %p2105_p1 = scmp.ne.s32.totalorder %s187_s2, %s2104_s1  ;;  %p2109_p2 = scmp.lt.s32.totalorder %s187_s2, %s187_s2 }
 0x10a   :  { %p2110_p3 = scmp.lt.s32.totalorder %s2108_s24, %s2104_s1 }
 0x10c   :  { %p2111_p4 = por %p2110_p3, %p2109_p2 }
 0x10e   :  { %p2112_p5 = pnand %p2111_p4, %p2105_p1 }
 0x110   :  { %2115 = shalt.err (!%p2112_p5)
}
 0x111   :  { %189 = dma.hbm_to_vmem [thread:$0]  %s3060_s17, 16, %s187_s2, [#allocation21]  }
 0x112   :  { %2248 = dma.done.wait [#allocation3], 128  }
 0x113   :  { %2249 = vsyncadd [#allocation3], 4294967168 }
 0x114   :  { %2250 = dma.done.wait [#allocation6], 272  }
 0x115   :  { %2251 = vsyncadd [#allocation6], 4294967024 }
 0x116   :  { %2252 = dma.done.wait [#allocation9], 2064  }
 0x117   :  { %2253 = vsyncadd [#allocation9], 4294965232 }
 0x118   :  { %2254 = dma.done.wait [#allocation12], 32  }
 0x119   :  { %2255 = vsyncadd [#allocation12], 4294967264 }
 0x11a   :  { %2256 = dma.done.wait [#allocation15], 2064  }
 0x11b   :  { %2257 = vsyncadd [#allocation15], 4294965232 }
 0x11c   :  { %2258 = dma.done.wait [#allocation18], 2064  }
 0x11d   :  { %2259 = vsyncadd [#allocation18], 4294965232 }
 0x11e   :  { %2260 = dma.done.wait [#allocation21], 2064  }
 0x11f   :  { %2261 = vsyncadd [#allocation21], 4294965232  ;;  %v2287_v0 = vmov 0.0|0.0   ;;  %vm2288_vm0 = vmmov 0   ;;  %v2289_v1 = vmov 0.0   ;;  %s3096_s0 = sld [smem:[#allocation45_spill]] }
 0x120   :  { %1586 = vmatprep.subr.bf16.mxu0 %v2287_v0  ;;  %1389 = vmatprep.mubr.msk.f32.mxu0 %vm2288_vm0, %v2289_v1  ;;  %s3097_s16 = sld [smem:[#allocation47_spill]]  ;;  %v233_v47 = vld [vmem:[#allocation2] sm:$0xff]  ;;  %v425_v52 = vld [vmem:[#allocation10 + $0x18] sm:$0xff]  ;;  %v424_v55 = vld [vmem:[#allocation10 + $0x10] sm:$0xff]  ;;  %s3098_s2 = sld [smem:[#allocation51_spill]]  ;;  %vm450_vm1 = vcmask 523264  }
 0x121   :  { %1610 = vmatprep.subr.bf16.mxu1 %v2287_v0  ;;  %1424 = vmatprep.mubr.msk.f32.mxu1 %vm2288_vm0, %v2289_v1  ;;  %v423_v51 = vld [vmem:[#allocation10 + $0x8] sm:$0xff]  ;;  %v422_v53 = vld [vmem:[#allocation10] sm:$0xff]  ;;  %v429_v57 = vld [vmem:[#allocation10 + $0x38] sm:$0xff]  ;;  %s3099_s3 = sld [smem:[#allocation50_spill]] }
 0x122   :  { %v1634_v54 = vpack.c.bf16 %v425_v52, %v423_v51  ;;  %v427_v56 = vld [vmem:[#allocation10 + $0x28] sm:$0xff]  ;;  %v1636_v58 = vpack.c.bf16 %v424_v55, %v422_v53  ;;  %v426_v60 = vld [vmem:[#allocation10 + $0x20] sm:$0xff]  ;;  %v428_v61 = vld [vmem:[#allocation10 + $0x30] sm:$0xff] }
 0x123   :  { %v1638_v59 = vpack.c.bf16 %v429_v57, %v427_v56  ;;  %v431_v62 = vld [vmem:[#allocation10 + $0x48] sm:$0xff]  ;;  %v433_v63 = vld [vmem:[#allocation10 + $0x58] sm:$0xff] }
 0x125   :  { %v234_v2 = vld [vmem:[%s3096_s0] sm:$0xff]  ;;  %v235_v3 = vld [vmem:[%s3096_s0 + $0x8] sm:$0xff]  ;;  %v236_v4 = vld [vmem:[%s3096_s0 + $0x10] sm:$0xff] }
 0x126   :  { %v1587_v5 = vpack.c.bf16 %v235_v3, %v234_v2  ;;  %v237_v6 = vld [vmem:[%s3096_s0 + $0x18] sm:$0xff]  ;;  %v238_v8 = vld [vmem:[%s3096_s0 + $0x20] sm:$0xff]  ;;  %v239_v9 = vld [vmem:[%s3096_s0 + $0x28] sm:$0xff]  ;;  %v1640_v2 = vpack.c.bf16 %v428_v61, %v426_v60  ;;  %v1642_v3 = vpack.c.bf16 %v433_v63, %v431_v62 }
 0x127   :  { %v1590_v7 = vpack.c.bf16 %v237_v6, %v236_v4  ;;  %v328_v10 = vld [vmem:[%s3097_s16] sm:$0xff]  ;;  %v329_v11 = vld [vmem:[%s3097_s16 + $0x8] sm:$0xff]  ;;  %v330_v12 = vld [vmem:[%s3097_s16 + $0x10] sm:$0xff]  ;;  %v1593_v14 = vpack.c.bf16 %v239_v9, %v238_v8 }
 0x128   :  { %1588 = vmatpush3.bf16.msra.mxu0 %v1587_v5  ;;  %v331_v13 = vld [vmem:[%s3097_s16 + $0x18] sm:$0xff]  ;;  %v1611_v15 = vpack.c.bf16 %v329_v11, %v328_v10  ;;  %v240_v16 = vld [vmem:[%s3096_s0 + $0x30] sm:$0xff]  ;;  %v332_v19 = vld [vmem:[%s3097_s16 + $0x20] sm:$0xff] }
 0x129   :  { %1589 = vmatprep.subr.bf16.mxu0 %v2287_v0  ;;  %v241_v17 = vld [vmem:[%s3096_s0 + $0x38] sm:$0xff]  ;;  %v1614_v18 = vpack.c.bf16 %v331_v13, %v330_v12  ;;  %v333_v20 = vld [vmem:[%s3097_s16 + $0x28] sm:$0xff]  ;;  %v242_v22 = vld [vmem:[%s3096_s0 + $0x40] sm:$0xff] }
 0x12a   :  { %1612 = vmatpush3.bf16.msra.mxu1 %v1611_v15  ;;  %v1596_v21 = vpack.c.bf16 %v241_v17, %v240_v16  ;;  %v243_v23 = vld [vmem:[%s3096_s0 + $0x48] sm:$0xff]  ;;  %v1617_v24 = vpack.c.bf16 %v333_v20, %v332_v19  ;;  %v334_v25 = vld [vmem:[%s3097_s16 + $0x30] sm:$0xff]  ;;  %v335_v26 = vld [vmem:[%s3097_s16 + $0x38] sm:$0xff] }
 0x12b   :  { %1613 = vmatprep.subr.bf16.mxu1 %v2287_v0  ;;  %v1599_v27 = vpack.c.bf16 %v243_v23, %v242_v22  ;;  %v244_v28 = vld [vmem:[%s3096_s0 + $0x50] sm:$0xff]  ;;  %v245_v29 = vld [vmem:[%s3096_s0 + $0x58] sm:$0xff]  ;;  %v1620_v30 = vpack.c.bf16 %v335_v26, %v334_v25  ;;  %v336_v31 = vld [vmem:[%s3097_s16 + $0x40] sm:$0xff] }
 0x12c   :  { %1591 = vmatpush3.bf16.msra.mxu0 %v1590_v7  ;;  %v337_v32 = vld [vmem:[%s3097_s16 + $0x48] sm:$0xff]  ;;  %v1602_v33 = vpack.c.bf16 %v245_v29, %v244_v28  ;;  %v246_v34 = vld [vmem:[%s3096_s0 + $0x60] sm:$0xff]  ;;  %v338_v37 = vld [vmem:[%s3097_s16 + $0x50] sm:$0xff] }
 0x12d   :  { %1592 = vmatprep.subr.bf16.mxu0 %v2287_v0  ;;  %v247_v35 = vld [vmem:[%s3096_s0 + $0x68] sm:$0xff]  ;;  %v1623_v36 = vpack.c.bf16 %v337_v32, %v336_v31  ;;  %v339_v38 = vld [vmem:[%s3097_s16 + $0x58] sm:$0xff]  ;;  %v248_v40 = vld [vmem:[%s3096_s0 + $0x70] sm:$0xff] }
 0x12e   :  { %1615 = vmatpush3.bf16.msra.mxu1 %v1614_v18  ;;  %v1605_v39 = vpack.c.bf16 %v247_v35, %v246_v34  ;;  %v249_v41 = vld [vmem:[%s3096_s0 + $0x78] sm:$0xff]  ;;  %v1626_v42 = vpack.c.bf16 %v339_v38, %v338_v37  ;;  %v340_v43 = vld [vmem:[%s3097_s16 + $0x60] sm:$0xff]  ;;  %v341_v44 = vld [vmem:[%s3097_s16 + $0x68] sm:$0xff] }
 0x12f   :  { %1616 = vmatprep.subr.bf16.mxu1 %v2287_v0  ;;  %v1608_v45 = vpack.c.bf16 %v249_v41, %v248_v40  ;;  %v1629_v46 = vpack.c.bf16 %v341_v44, %v340_v43  ;;  %v342_v48 = vld [vmem:[%s3097_s16 + $0x70] sm:$0xff]  ;;  %v343_v49 = vld [vmem:[%s3097_s16 + $0x78] sm:$0xff]  ;;  %v435_v12 = vld [vmem:[#allocation10 + $0x68] sm:$0xff]  ;;  %s2291_s16 = smov [#allocation27]  }
 0x130   :  { %1594 = vmatpush3.bf16.msra.mxu0 %v1593_v14  ;;  %v1632_v50 = vpack.c.bf16 %v343_v49, %v342_v48  ;;  %v430_v4 = vld [vmem:[#allocation10 + $0x40] sm:$0xff]  ;;  %v432_v5 = vld [vmem:[#allocation10 + $0x50] sm:$0xff]  ;;  %v1237_v7 = vld [vmem:[#allocation7] ss:$0 sm:$0xff]  ;;  %s1184_s17 = sshll.u32 %s2291_s16, 4  ;;  %s1185_s17 = int_to_ptr.vmem [resolvable:$true] %s1184_s17 }
 0x131   :  { %1595 = vmatprep.subr.bf16.mxu0 %v2287_v0  ;;  %v1644_v6 = vpack.c.bf16 %v432_v5, %v430_v4  ;;  %v437_v13 = vld [vmem:[#allocation10 + $0x78] sm:$0xff]  ;;  %v434_v15 = vld [vmem:[#allocation10 + $0x60] sm:$0xff]  ;;  %v436_v16 = vld [vmem:[#allocation10 + $0x70] sm:$0xff] }
 0x132   :  { %1618 = vmatpush3.bf16.msra.mxu1 %v1617_v24  ;;  %v1646_v14 = vpack.c.bf16 %v437_v13, %v435_v12  ;;  %v1648_v17 = vpack.c.bf16 %v436_v16, %v434_v15  ;;  %v536_v18 = vld [vmem:[%s3098_s2] sm:$0xff]  ;;  %v537_v19 = vld [vmem:[%s3098_s2 + $0x8] sm:$0xff]  ;;  %v538_v20 = vld [vmem:[%s3098_s2 + $0x10] sm:$0xff] }
 0x133   :  { %1619 = vmatprep.subr.bf16.mxu1 %v2287_v0  ;;  %v539_v22 = vld [vmem:[%s3098_s2 + $0x18] sm:$0xff]  ;;  %v540_v29 = vld [vmem:[%s3098_s2 + $0x20] sm:$0xff]  ;;  %v542_v32 = vld [vmem:[%s3098_s2 + $0x30] sm:$0xff] }
 0x134   :  { %1597 = vmatpush3.bf16.msra.mxu0 %v1596_v21  ;;  %v1651_v21 = vpack.c.bf16 %v537_v19, %v536_v18  ;;  %v1654_v23 = vpack.c.bf16 %v539_v22, %v538_v20  ;;  %v1238_v24 = vld [vmem:[#allocation8] ss:$0 sm:$0xff]  ;;  %v544_v35 = vld [vmem:[%s3098_s2 + $0x40] sm:$0xff]  ;;  %v546_v38 = vld [vmem:[%s3098_s2 + $0x50] sm:$0xff] }
 0x135   :  { %1598 = vmatprep.subr.bf16.mxu0 %v2287_v0  ;;  %v548_v41 = vld [vmem:[%s3098_s2 + $0x60] sm:$0xff]  ;;  %v550_v44 = vld [vmem:[%s3098_s2 + $0x70] sm:$0xff]  ;;  %v530_v60 = vld [vmem:[#allocation5] sm:$0xff] }
 0x136   :  { %1621 = vmatpush3.bf16.msra.mxu1 %v1620_v30  ;;  %v541_v30 = vld [vmem:[%s3098_s2 + $0x28] sm:$0xff]  ;;  %v531_v61 = vld [vmem:[#allocation5 + $0x8] sm:$0xff]  ;;  %v634_v12 = vld [vmem:[%s3053_s10 + $0x20] sm:$0xff] }
 0x137   :  { %1622 = vmatprep.subr.bf16.mxu1 %v2287_v0  ;;  %v1657_v31 = vpack.c.bf16 %v541_v30, %v540_v29  ;;  %v635_v13 = vld [vmem:[%s3053_s10 + $0x28] sm:$0xff]  ;;  %v636_v15 = vld [vmem:[%s3053_s10 + $0x30] sm:$0xff]  ;;  %v637_v16 = vld [vmem:[%s3053_s10 + $0x38] sm:$0xff] }
 0x138   :  { %1600 = vmatpush3.bf16.msra.mxu0 %v1599_v27  ;;  %v817_v18 = vld [vmem:[#allocation17] sm:$0xff]  ;;  %v818_v19 = vld [vmem:[#allocation17 + $0x8] sm:$0xff]  ;;  %v820_v22 = vld [vmem:[#allocation17 + $0x18] sm:$0xff] }
 0x139   :  { %1601 = vmatprep.subr.bf16.mxu0 %v2287_v0  ;;  %v1711_v20 = vpack.c.bf16 %v818_v19, %v817_v18  ;;  %v825_v30 = vld [vmem:[#allocation17 + $0x40] sm:$0xff]  ;;  %v922_v18 = vld [vmem:[#allocation20 + $0x8] sm:$0xff] }
 0x13a   :  { %1624 = vmatpush3.bf16.msra.mxu1 %v1623_v36  ;;  %v545_v36 = vld [vmem:[%s3098_s2 + $0x48] sm:$0xff]  ;;  %v1019_v19 = vld [vmem:[%s3061_s18] sm:$0xff] }
 0x13b   :  { %1625 = vmatprep.subr.bf16.mxu1 %v2287_v0  ;;  %v1663_v37 = vpack.c.bf16 %v545_v36, %v544_v35  ;;  %v829_v36 = vld [vmem:[#allocation17 + $0x60] sm:$0xff] }
 0x13c   :  { %1603 = vmatpush3.bf16.msra.mxu0 %v1602_v33  ;;  %v543_v33 = vld [vmem:[%s3098_s2 + $0x38] sm:$0xff] }
 0x13d   :  { %1604 = vmatprep.subr.bf16.mxu0 %v2287_v0  ;;  %v1660_v34 = vpack.c.bf16 %v543_v33, %v542_v32  ;;  %v827_v33 = vld [vmem:[#allocation17 + $0x50] sm:$0xff] }
 0x13e   :  { %1627 = vmatpush3.bf16.msra.mxu1 %v1626_v42  ;;  %v549_v42 = vld [vmem:[%s3098_s2 + $0x68] sm:$0xff] }
 0x13f   :  { %1628 = vmatprep.subr.bf16.mxu1 %v2287_v0  ;;  %v1669_v43 = vpack.c.bf16 %v549_v42, %v548_v41  ;;  %v720_v41 = vld [vmem:[#allocation14 + $0x8] sm:$0xff] }
 0x140   :  { %1606 = vmatpush3.bf16.msra.mxu0 %v1605_v39  ;;  %v547_v39 = vld [vmem:[%s3098_s2 + $0x58] sm:$0xff] }
 0x141   :  { %1607 = vmatprep.subr.bf16.mxu0 %v2287_v0  ;;  %v1666_v40 = vpack.c.bf16 %v547_v39, %v546_v38  ;;  %v1240_v39 = vld [vmem:[#allocation11] ss:$0 sm:$0xff] }
 0x142   :  { %1630 = vmatpush3.bf16.msra.mxu1 %v1629_v46 }
 0x143   :  { %1631 = vmatprep.subr.bf16.mxu1 %v2287_v0 }
 0x144   :  { %1609 = vmatpush3.bf16.msra.mxu0 %v1608_v45  ;;  %v551_v45 = vld [vmem:[%s3098_s2 + $0x78] sm:$0xff] }
 0x145   :  { %1635 = vmatprep.subr.bf16.mxu0 %v1634_v54  ;;  %v1672_v46 = vpack.c.bf16 %v551_v45, %v550_v44 }
 0x146   :  { %1633 = vmatpush3.bf16.msra.mxu1 %v1632_v50  ;;  %v438_v50 = vld [vmem:[%s3099_s3] sm:$0x3] }
 0x147   :  { %1390 = vmatmul.mubr.f32.vlgmr.msra.gmra.mrb[0].mxu0 %v233_v47  ;;  %1650 = vmatprep.subr.bf16.mxu1 %v2287_v0  ;;  %v440_v47 = vlaneseq }
 0x148   :  { %518 = vmatprep.mubr.f32.mxu0 %v2289_v1  ;;  %1637 = vmatpush1.bf16.msra.mxu0 %v1636_v58 }
 0x149   :  { %1639 = vmatprep.subr.bf16.mxu0 %v1638_v59  ;;  %v2785_v48 = vshrl.u32 %v440_v47, 7  ;;  %v721_v47 = vld [vmem:[#allocation14 + $0x10] sm:$0xff] }
 0x14b   :  { %v442_v49 = vsub.s32 0, %v2785_v48  ;;  %v446_v51 = vsub.s32 1, %v2785_v48 }
 0x14c   :  { %1641 = vmatpush1.bf16.msra.mxu0 %v1640_v2 }
 0x14d   :  { %1643 = vmatprep.subr.bf16.mxu0 %v1642_v3  ;;  %v443_v52 = vrot.slane %v438_v50, %v442_v49  ;;  %v447_v53 = vrot.slane %v438_v50, %v446_v51  ;;  %v722_v50 = vld [vmem:[#allocation14 + $0x18] sm:$0xff] }
 0x150   :  { %1645 = vmatpush1.bf16.msra.mxu0 %v1644_v6  ;;  %v630_v6 = vld [vmem:[%s3053_s10] sm:$0xff] }
 0x151   :  { %1647 = vmatprep.subr.bf16.mxu0 %v1646_v14  ;;  %v1681_v14 = vpack.c.bf16 %v635_v13, %v634_v12  ;;  %v1020_v13 = vld [vmem:[%s3061_s18 + $0x8] sm:$0xff] }
 0x154   :  { %1649 = vmatpush1.bf16.msra.mxu0 %v1648_v17  ;;  %v1684_v17 = vpack.c.bf16 %v637_v16, %v636_v15  ;;  %v1241_v16 = vld [vmem:[#allocation13] ss:$0 sm:$0xff] }
 0x155   :  { %1674 = vmatprep.subr.bf16.mxu0 %v2287_v0 }
 0x21a   :  { %v323_v8 = vpop.f32.mrb[0].mxu0 }
 0x21b   :  { %v324_v9 = vadd.f32 %v1237_v7, %v323_v8  ;;  %v1391_v10 = vpop.f32.mrb[1].mxu0  ;;  %v631_v7 = vld [vmem:[%s3053_s10 + $0x8] sm:$0xff]  ;;  %v632_v8 = vld [vmem:[%s3053_s10 + $0x10] sm:$0xff] }
 0x21c   :  { %v633_v10 = vld [vmem:[%s3053_s10 + $0x18] sm:$0xff] }
 0x21d   :  { %v327_v11 = vmax.f32 %v324_v9, 0.0  ;;  %v1675_v9 = vpack.c.bf16 %v631_v7, %v630_v6  ;;  %v733_v7 = vld [vmem:[#allocation14 + $0x70] sm:$0xff] }
 0x21f   :  { %1425 = vmatmul.mubr.f32.vlgmr.msra.gmra.mrb[0].mxu1 %v327_v11  ;;  %v1678_v11 = vpack.c.bf16 %v633_v10, %v632_v8  ;;  %v734_v8 = vld [vmem:[#allocation14 + $0x78] sm:$0xff] }
 0x220   :  { %1459 = vmatprep.mubr.msk.f32.mxu1 %vm2288_vm0, %v2289_v1  ;;  %1652 = vmatpush3.bf16.msra.mxu1 %v1651_v21  ;;  %v819_v21 = vld [vmem:[#allocation17 + $0x10] sm:$0xff]  ;;  %v1708_v10 = vpack.c.bf16 %v734_v8, %v733_v7  ;;  %v932_v8 = vld [vmem:[#allocation20 + $0x58] sm:$0xff] }
 0x221   :  { %1653 = vmatprep.subr.bf16.mxu1 %v2287_v0 }
 0x224   :  { %1655 = vmatpush3.bf16.msra.mxu1 %v1654_v23  ;;  %v1714_v23 = vpack.c.bf16 %v820_v22, %v819_v21  ;;  %v1024_v22 = vld [vmem:[%s3061_s18 + $0x28] sm:$0xff] }
 0x225   :  { %1656 = vmatprep.subr.bf16.mxu1 %v2287_v0 }
 0x228   :  { %1658 = vmatpush3.bf16.msra.mxu1 %v1657_v31  ;;  %v826_v31 = vld [vmem:[#allocation17 + $0x48] sm:$0xff] }
 0x229   :  { %1659 = vmatprep.subr.bf16.mxu1 %v2287_v0  ;;  %v1723_v32 = vpack.c.bf16 %v826_v31, %v825_v30  ;;  %v924_v31 = vld [vmem:[#allocation20 + $0x18] sm:$0xff] }
 0x22c   :  { %1661 = vmatpush3.bf16.msra.mxu1 %v1660_v34  ;;  %v828_v34 = vld [vmem:[#allocation17 + $0x58] sm:$0xff] }
 0x22d   :  { %1662 = vmatprep.subr.bf16.mxu1 %v2287_v0  ;;  %v1726_v35 = vpack.c.bf16 %v828_v34, %v827_v33  ;;  %v1025_v33 = vld [vmem:[%s3061_s18 + $0x30] sm:$0xff]  ;;  %v1028_v34 = vld [vmem:[%s3061_s18 + $0x48] sm:$0xff] }
 0x230   :  { %1664 = vmatpush3.bf16.msra.mxu1 %v1663_v37  ;;  %v830_v37 = vld [vmem:[#allocation17 + $0x68] sm:$0xff] }
 0x231   :  { %1665 = vmatprep.subr.bf16.mxu1 %v2287_v0  ;;  %v1729_v38 = vpack.c.bf16 %v830_v37, %v829_v36 }
 0x234   :  { %1667 = vmatpush3.bf16.msra.mxu1 %v1666_v40  ;;  %v719_v40 = vld [vmem:[#allocation14] sm:$0xff] }
 0x235   :  { %1668 = vmatprep.subr.bf16.mxu1 %v2287_v0  ;;  %v1687_v45 = vpack.c.bf16 %v720_v41, %v719_v40  ;;  %v926_v40 = vld [vmem:[#allocation20 + $0x28] sm:$0xff]  ;;  %v1027_v41 = vld [vmem:[%s3061_s18 + $0x40] sm:$0xff] }
 0x238   :  { %1670 = vmatpush3.bf16.msra.mxu1 %v1669_v43 }
 0x239   :  { %1671 = vmatprep.subr.bf16.mxu1 %v2287_v0 }
 0x23c   :  { %1673 = vmatpush3.bf16.msra.mxu1 %v1672_v46 }
 0x23d   :  { %1710 = vmatprep.subr.bf16.mxu1 %v2287_v0 }
 0x2f2   :  { %v417_v25 = vpop.f32.mrb[0].mxu1 }
 0x2f3   :  { %v418_v26 = vadd.f32 %v1238_v24, %v417_v25  ;;  %v1426_v27 = vpop.f32.mrb[1].mxu1  ;;  %v821_v24 = vld [vmem:[#allocation17 + $0x20] sm:$0xff]  ;;  %v822_v25 = vld [vmem:[#allocation17 + $0x28] sm:$0xff] }
 0x2f4   :  { %v823_v27 = vld [vmem:[#allocation17 + $0x30] sm:$0xff] }
 0x2f5   :  { %v421_v28 = vmax.f32 %v418_v26, 0.0  ;;  %v1717_v26 = vpack.c.bf16 %v822_v25, %v821_v24 }
 0x2f7   :  { %1239 = vmatmul.mubr.msk.f32.vlgmr.msra.gmra.mrb[2].mxu0 %vm450_vm1, %v421_v28  ;;  %v824_v28 = vld [vmem:[#allocation17 + $0x38] sm:$0xff] }
 0x2f8   :  { %1478 = vmatprep.mubr.msk.f32.mxu0 %vm2288_vm0, %v2289_v1  ;;  %1676 = vmatpush3.bf16.msra.mxu0 %v1675_v9  ;;  %v1720_v29 = vpack.c.bf16 %v824_v28, %v823_v27  ;;  %v831_v9 = vld [vmem:[#allocation17 + $0x70] sm:$0xff] }
 0x2f9   :  { %1677 = vmatprep.subr.bf16.mxu0 %v2287_v0  ;;  %v923_v28 = vld [vmem:[#allocation20 + $0x10] sm:$0xff] }
 0x2fa   :  { %v1738_v36 = vpack.c.bf16 %v924_v31, %v923_v28  ;;  %v1049_v28 = vld [vmem:[%s3061_s18 + $0xf0] sm:$0xff] }
 0x2fc   :  { %1679 = vmatpush3.bf16.msra.mxu0 %v1678_v11  ;;  %v832_v11 = vld [vmem:[#allocation17 + $0x78] sm:$0xff] }
 0x2fd   :  { %1680 = vmatprep.subr.bf16.mxu0 %v2287_v0  ;;  %v1732_v12 = vpack.c.bf16 %v832_v11, %v831_v9  ;;  %v1039_v9 = vld [vmem:[%s3061_s18 + $0xa0] sm:$0xff]  ;;  %v1044_v11 = vld [vmem:[%s3061_s18 + $0xc8] sm:$0xff] }
 0x300   :  { %1682 = vmatpush3.bf16.msra.mxu0 %v1681_v14  ;;  %v1022_v14 = vld [vmem:[%s3061_s18 + $0x18] sm:$0xff] }
 0x301   :  { %1683 = vmatprep.subr.bf16.mxu0 %v2287_v0  ;;  %v1758_v15 = vpack.c.bf16 %v1022_v14, %v1020_v13 }
 0x304   :  { %1685 = vmatpush3.bf16.msra.mxu0 %v1684_v17  ;;  %v921_v17 = vld [vmem:[#allocation20] sm:$0xff] }
 0x305   :  { %1686 = vmatprep.subr.bf16.mxu0 %v2287_v0 }
 0x3ca   :  { %v520_v54 = vpop.f32.mrb[2].mxu0 }
 0x3cb   :  { %v521_v55 = vadd.f32 %v520_v54, %v443_v52  ;;  %v522_v56 = vpop.f32.mrb[3].mxu0  ;;  %v1690_v52 = vpack.c.bf16 %v722_v50, %v721_v47  ;;  %v724_v54 = vld [vmem:[#allocation14 + $0x28] sm:$0xff]  ;;  %v927_v47 = vld [vmem:[#allocation20 + $0x30] sm:$0xff] }
 0x3cc   :  { %v523_v57 = vadd.f32 %v522_v56, %v447_v53  ;;  %v723_v53 = vld [vmem:[#allocation14 + $0x20] sm:$0xff]  ;;  %v725_v56 = vld [vmem:[#allocation14 + $0x30] sm:$0xff] }
 0x3cd   :  { %525 = vst [vmem:[#allocation23] sm:$0xff] %v521_v55 }
 0x3ce   :  { %526 = vst [vmem:[#allocation23 + $0x8] sm:$0xff] %v523_v57  ;;  %v527_v58 = vmul.f32 0.5, %v523_v57  ;;  %v726_v57 = vld [vmem:[#allocation14 + $0x38] sm:$0xff] }
 0x3d0   :  { %v528_v59 = vmul.f32 1.442695, %v527_v58  ;;  %v1696_v58 = vpack.c.bf16 %v726_v57, %v725_v56 }
 0x3d2   :  { %1816 = vpow2.f32 %v528_v59  ;;  %v727_v59 = vld [vmem:[#allocation14 + $0x40] sm:$0xff] }
 0x3dc   :  { %v1817_v62 = vpop.eup %1816 }
 0x3dd   :  { %v532_v63 = vmul.f32 %v1817_v62, %v530_v60  ;;  %v534_v2 = vmul.f32 %v1817_v62, %v531_v61  ;;  %v728_v60 = vld [vmem:[#allocation14 + $0x48] sm:$0xff]  ;;  %v729_v62 = vld [vmem:[#allocation14 + $0x50] sm:$0xff] }
 0x3de   :  { %v1699_v61 = vpack.c.bf16 %v728_v60, %v727_v59  ;;  %v930_v60 = vld [vmem:[#allocation20 + $0x48] sm:$0xff] }
 0x3df   :  { %v533_v3 = vadd.f32 %v532_v63, %v521_v55  ;;  %v2796_v4 = vadd.f32 %v534_v2, %v521_v55  ;;  %v1693_v55 = vpack.c.bf16 %v724_v54, %v723_v53  ;;  %v730_v63 = vld [vmem:[#allocation14 + $0x58] sm:$0xff]  ;;  %v1031_v53 = vld [vmem:[%s3061_s18 + $0x60] sm:$0xff]  ;;  %v1033_v54 = vld [vmem:[%s3061_s18 + $0x70] sm:$0xff] }
 0x3e0   :  { %v1702_v2 = vpack.c.bf16 %v730_v63, %v729_v62  ;;  %v1772_v57 = vpack.c.bf16 %v1033_v54, %v1031_v53  ;;  %v1037_v62 = vld [vmem:[%s3061_s18 + $0x90] sm:$0xff]  ;;  %v1040_v63 = vld [vmem:[%s3061_s18 + $0xa8] sm:$0xff] }
 0x3e1   :  { %1460 = vmatmul.mubr.f32.vlgmr.msra.gmra.mrb[2].mxu1 %v533_v3  ;;  %v1134_v5 = vmul.f32 %v2796_v4, %v2796_v4  ;;  %v731_v3 = vld [vmem:[#allocation14 + $0x60] sm:$0xff] }
 0x3e2   :  { %1548 = vmatprep.mubr.msk.f32.mxu1 %vm2288_vm0, %v2289_v1  ;;  %1712 = vmatpush3.bf16.msra.mxu1 %v1711_v20  ;;  %v1021_v20 = vld [vmem:[%s3061_s18 + $0x10] sm:$0xff] }
 0x3e3   :  { %1135 = vadd.xlane.f32.xlu0 %v1134_v5  ;;  %1713 = vmatprep.subr.bf16.mxu1 %v2287_v0  ;;  %v732_v5 = vld [vmem:[#allocation14 + $0x68] sm:$0xff]  ;;  %v1760_v27 = vpack.c.bf16 %v1021_v20, %v1019_v19  ;;  %v1045_v19 = vld [vmem:[%s3061_s18 + $0xd0] sm:$0xff] }
 0x3e4   :  { %v1705_v6 = vpack.c.bf16 %v732_v5, %v731_v3  ;;  %v1048_v20 = vld [vmem:[%s3061_s18 + $0xe8] sm:$0xff] }
 0x3e6   :  { %1715 = vmatpush3.bf16.msra.mxu1 %v1714_v23  ;;  %v1026_v23 = vld [vmem:[%s3061_s18 + $0x38] sm:$0xff] }
 0x3e7   :  { %1716 = vmatprep.subr.bf16.mxu1 %v2287_v0  ;;  %v1762_v30 = vpack.c.bf16 %v1026_v23, %v1024_v22 }
 0x3ea   :  { %1718 = vmatpush3.bf16.msra.mxu1 %v1717_v26  ;;  %v1735_v26 = vpack.c.bf16 %v922_v18, %v921_v17  ;;  %v934_v17 = vld [vmem:[#allocation20 + $0x68] sm:$0xff]  ;;  %v1043_v18 = vld [vmem:[%s3061_s18 + $0xc0] sm:$0xff] }
 0x3eb   :  { %1719 = vmatprep.subr.bf16.mxu1 %v2287_v0  ;;  %v1784_v23 = vpack.c.bf16 %v1045_v19, %v1043_v18 }
 0x3ee   :  { %1721 = vmatpush3.bf16.msra.mxu1 %v1720_v29 }
 0x3ef   :  { %1722 = vmatprep.subr.bf16.mxu1 %v2287_v0 }
 0x3f2   :  { %1724 = vmatpush3.bf16.msra.mxu1 %v1723_v32  ;;  %v1023_v32 = vld [vmem:[%s3061_s18 + $0x20] sm:$0xff] }
 0x3f3   :  { %1725 = vmatprep.subr.bf16.mxu1 %v2287_v0  ;;  %v1764_v37 = vpack.c.bf16 %v1025_v33, %v1023_v32  ;;  %v1243_v32 = vld [vmem:[#allocation16] ss:$0 sm:$0xff]  ;;  %v1244_v33 = vld [vmem:[#allocation19] ss:$0 sm:$0xff] }
 0x3f6   :  { %1727 = vmatpush3.bf16.msra.mxu1 %v1726_v35  ;;  %v1030_v35 = vld [vmem:[%s3061_s18 + $0x58] sm:$0xff] }
 0x3f7   :  { %1728 = vmatprep.subr.bf16.mxu1 %v2287_v0 }
 0x3fa   :  { %1730 = vmatpush3.bf16.msra.mxu1 %v1729_v38  ;;  %v925_v38 = vld [vmem:[#allocation20 + $0x20] sm:$0xff] }
 0x3fb   :  { %1731 = vmatprep.subr.bf16.mxu1 %v2287_v0 }
 0x3fe   :  { %1733 = vmatpush3.bf16.msra.mxu1 %v1732_v12  ;;  %v1046_v12 = vld [vmem:[%s3061_s18 + $0xd8] sm:$0xff] }
 0x3ff   :  { %1759 = vmatprep.subr.bf16.mxu1 %v1758_v15  ;;  %v933_v15 = vld [vmem:[#allocation20 + $0x60] sm:$0xff] }
 0x400   :  { %v1753_v22 = vpack.c.bf16 %v934_v17, %v933_v15 }
 0x4b4   :  { %v625_v42 = vpop.f32.mrb[2].mxu1 }
 0x4b5   :  { %v626_v43 = vadd.f32 %v1240_v39, %v625_v42  ;;  %v1461_v44 = vpop.f32.mrb[3].mxu1  ;;  %v1766_v39 = vpack.c.bf16 %v1030_v35, %v1028_v34  ;;  %v1029_v42 = vld [vmem:[%s3061_s18 + $0x50] sm:$0xff] }
 0x4b6   :  { %v1034_v44 = vld [vmem:[%s3061_s18 + $0x78] sm:$0xff] }
 0x4b7   :  { %v629_v46 = vmax.f32 %v626_v43, 0.0  ;;  %v1032_v43 = vld [vmem:[%s3061_s18 + $0x68] sm:$0xff] }
 0x4b8   :  { %v1770_v50 = vpack.c.bf16 %v1034_v44, %v1032_v43 }
 0x4b9   :  { %1479 = vmatmul.mubr.msk.f32.vlgmr.msra.gmra.mrb[4].mxu0 %vm450_vm1, %v629_v46  ;;  %v1768_v46 = vpack.c.bf16 %v1029_v42, %v1027_v41 }
 0x4ba   :  { %1688 = vmatpush3.bf16.msra.mxu0 %v1687_v45  ;;  %1513 = vmatprep.mubr.msk.f32.mxu0 %vm2288_vm0, %v2289_v1  ;;  %v1741_v45 = vpack.c.bf16 %v926_v40, %v925_v38 }
 0x4bb   :  { %1689 = vmatprep.subr.bf16.mxu0 %v2287_v0 }
 0x4be   :  { %1691 = vmatpush3.bf16.msra.mxu0 %v1690_v52  ;;  %v928_v52 = vld [vmem:[#allocation20 + $0x38] sm:$0xff] }
 0x4bf   :  { %1692 = vmatprep.subr.bf16.mxu0 %v2287_v0  ;;  %v1744_v56 = vpack.c.bf16 %v928_v52, %v927_v47 }
 0x4c2   :  { %1694 = vmatpush3.bf16.msra.mxu0 %v1693_v55  ;;  %v1038_v55 = vld [vmem:[%s3061_s18 + $0x98] sm:$0xff] }
 0x4c3   :  { %1695 = vmatprep.subr.bf16.mxu0 %v2287_v0 }
 0x4c6   :  { %1697 = vmatpush3.bf16.msra.mxu0 %v1696_v58  ;;  %v929_v58 = vld [vmem:[#allocation20 + $0x40] sm:$0xff] }
 0x4c7   :  { %1698 = vmatprep.subr.bf16.mxu0 %v2287_v0  ;;  %v1747_v3 = vpack.c.bf16 %v930_v60, %v929_v58  ;;  %v1136_v60 = vpop.xlane.xlu0 %1135 }
 0x4ca   :  { %1700 = vmatpush3.bf16.msra.mxu0 %v1699_v61  ;;  %v1035_v61 = vld [vmem:[%s3061_s18 + $0x80] sm:$0xff] }
 0x4cb   :  { %1701 = vmatprep.subr.bf16.mxu0 %v2287_v0  ;;  %v1776_v5 = vpack.c.bf16 %v1037_v62, %v1035_v61 }
 0x4ce   :  { %1703 = vmatpush3.bf16.msra.mxu0 %v1702_v2  ;;  %v1042_v2 = vld [vmem:[%s3061_s18 + $0xb8] sm:$0xff] }
 0x4cf   :  { %1704 = vmatprep.subr.bf16.mxu0 %v2287_v0  ;;  %v1778_v7 = vpack.c.bf16 %v1042_v2, %v1040_v63 }
 0x4d2   :  { %1706 = vmatpush3.bf16.msra.mxu0 %v1705_v6  ;;  %v931_v6 = vld [vmem:[#allocation20 + $0x50] sm:$0xff] }
 0x4d3   :  { %1707 = vmatprep.subr.bf16.mxu0 %v2287_v0  ;;  %v1750_v13 = vpack.c.bf16 %v932_v8, %v931_v6 }
 0x4d6   :  { %1709 = vmatpush3.bf16.msra.mxu0 %v1708_v10  ;;  %v1041_v10 = vld [vmem:[%s3061_s18 + $0xb0] sm:$0xff] }
 0x4d7   :  { %1734 = vmatprep.subr.bf16.mxu0 %v2287_v0  ;;  %v1780_v14 = vpack.c.bf16 %v1041_v10, %v1039_v9 }
 0x58c   :  { %v714_v21 = vpop.f32.mrb[4].mxu0 }
 0x58d   :  { %v715_v24 = vadd.f32 %v1241_v16, %v714_v21  ;;  %v1480_v25 = vpop.f32.mrb[5].mxu0  ;;  %v1782_v16 = vpack.c.bf16 %v1046_v12, %v1044_v11  ;;  %v1050_v21 = vld [vmem:[%s3061_s18 + $0xf8] sm:$0xff] }
 0x58e   :  { %v1786_v25 = vpack.c.bf16 %v1050_v21, %v1048_v20 }
 0x58f   :  { %v2866_v29 = vmax.f32 %v715_v24, 0.0  ;;  %v935_v24 = vld [vmem:[#allocation20 + $0x70] sm:$0xff] }
 0x591   :  { %1514 = vmatmul.mubr.f32.vlgmr.msra.gmra.mrb[6].mxu0 %v2866_v29  ;;  %1549 = vmatmul.mubr.f32.vlgmr.msra.gmra.mrb[4].mxu1 %v2866_v29 }
 0x592   :  { %1736 = vmatpush3.bf16.msra.mxu0 %v1735_v26  ;;  %1761 = vmatpush1.bf16.msra.mxu1 %v1760_v27  ;;  %v936_v26 = vld [vmem:[#allocation20 + $0x78] sm:$0xff] }
 0x593   :  { %1737 = vmatprep.subr.bf16.mxu0 %v2287_v0  ;;  %1763 = vmatprep.subr.bf16.mxu1 %v1762_v30  ;;  %v1047_v27 = vld [vmem:[%s3061_s18 + $0xe0] sm:$0xff]  ;;  %v1756_v30 = vpack.c.bf16 %v936_v26, %v935_v24 }
 0x594   :  { %1583 = vmatprep.mubr.msk.f32.mxu0 %vm2288_vm0, %v2289_v1  ;;  %1127 = vmatprep.mubr.f32.mxu1 %v2289_v1  ;;  %v1036_v1 = vld [vmem:[%s3061_s18 + $0x88] sm:$0xff]  ;;  %v1788_v31 = vpack.c.bf16 %v1049_v28, %v1047_v27 }
 0x595   :  { %v1774_v59 = vpack.c.bf16 %v1038_v55, %v1036_v1 }
 0x596   :  { %1739 = vmatpush3.bf16.msra.mxu0 %v1738_v36  ;;  %1765 = vmatpush1.bf16.msra.mxu1 %v1764_v37 }
 0x597   :  { %1740 = vmatprep.subr.bf16.mxu0 %v2287_v0  ;;  %1767 = vmatprep.subr.bf16.mxu1 %v1766_v39 }
 0x59a   :  { %1742 = vmatpush3.bf16.msra.mxu0 %v1741_v45  ;;  %1769 = vmatpush1.bf16.msra.mxu1 %v1768_v46 }
 0x59b   :  { %1743 = vmatprep.subr.bf16.mxu0 %v2287_v0  ;;  %1771 = vmatprep.subr.bf16.mxu1 %v1770_v50  ;;  %v1245_v50 = vld [vmem:[#allocation22] ss:$0 sm:$0xff] }
 0x59e   :  { %1745 = vmatpush3.bf16.msra.mxu0 %v1744_v56  ;;  %1773 = vmatpush1.bf16.msra.mxu1 %v1772_v57 }
 0x59f   :  { %1746 = vmatprep.subr.bf16.mxu0 %v2287_v0  ;;  %1775 = vmatprep.subr.bf16.mxu1 %v1774_v59 }
 0x5a2   :  { %1748 = vmatpush3.bf16.msra.mxu0 %v1747_v3  ;;  %1777 = vmatpush1.bf16.msra.mxu1 %v1776_v5 }
 0x5a3   :  { %1749 = vmatprep.subr.bf16.mxu0 %v2287_v0  ;;  %1779 = vmatprep.subr.bf16.mxu1 %v1778_v7 }
 0x5a6   :  { %1751 = vmatpush3.bf16.msra.mxu0 %v1750_v13  ;;  %1781 = vmatpush1.bf16.msra.mxu1 %v1780_v14 }
 0x5a7   :  { %1752 = vmatprep.subr.bf16.mxu0 %v2287_v0  ;;  %1783 = vmatprep.subr.bf16.mxu1 %v1782_v16 }
 0x5aa   :  { %1754 = vmatpush3.bf16.msra.mxu0 %v1753_v22  ;;  %1785 = vmatpush1.bf16.msra.mxu1 %v1784_v23 }
 0x5ab   :  { %1755 = vmatprep.subr.bf16.mxu0 %v2287_v0  ;;  %1787 = vmatprep.subr.bf16.mxu1 %v1786_v25 }
 0x5ae   :  { %1757 = vmatpush3.bf16.msra.mxu0 %v1756_v30  ;;  %1789 = vmatpush1.bf16.msra.mxu1 %v1788_v31 }
 0x5b1   :  { %1584 = vmatmul.mubr.f32.vlgmr.msra.gmra.mrb[8].mxu0 %v2866_v29  ;;  %1128 = vmatmul.mubr.f32.vlgmr.msra.gmra.mrb[6].mxu1 %v2796_v4  ;;  %v1051_v4 = vld [vmem:[%s3062_s19] sm:$0x3]  ;;  %s2290_s19 = smov [#allocation24]  }
 0x5b2   :  { %v1056_v46 = vrot.slane %v1051_v4, %v442_v49  ;;  %v1060_v52 = vrot.slane %v1051_v4, %v446_v51  ;;  %s1164_s5 = sshll.u32 %s2290_s19, 4  ;;  %s1165_s5 = int_to_ptr.vmem [resolvable:$true] %s1164_s5 }
 0x5b3   :  { %s2116_s4 = scalar_lea.vmem %s1165_s5, 128  ;;  %p2121_p7 = scmp.lt.s32.totalorder %s1165_s5, %s1165_s5 }
 0x5b4   :  { %p2117_p6 = scmp.ne.s32.totalorder %s1165_s5, %s2116_s4  ;;  %p2122_p8 = scmp.lt.s32.totalorder %s2116_s4, %s2116_s4 }
 0x5b6   :  { %p2123_p9 = por %p2122_p8, %p2121_p7 }
 0x5b8   :  { %p2124_p10 = pnand %p2123_p9, %p2117_p6 }
 0x664   :  { %v808_v34 = vpop.f32.mrb[6].mxu0  ;;  %v906_v35 = vpop.f32.mrb[4].mxu1 }
 0x665   :  { %v809_v36 = vadd.f32 %v1243_v32, %v808_v34  ;;  %v907_v37 = vadd.f32 %v1244_v33, %v906_v35  ;;  %v1515_v38 = vpop.f32.mrb[7].mxu0  ;;  %v1550_v39 = vpop.f32.mrb[5].mxu1 }
 0x667   :  { %v812_v40 = vmul.f32 1.442695, %v809_v36  ;;  %v911_v41 = vmin.f32 %v907_v37, 20.0  ;;  %vm910_vm2 = vcmp.gt.f32.partialorder %v907_v37, 20.0 }
 0x669   :  { %1818 = vpow2.f32 %v812_v40  ;;  %v912_v42 = vmul.f32 1.442695, %v911_v41 }
 0x66b   :  { %1820 = vpow2.f32 %v912_v42 }
 0x673   :  { %v1819_v0 = vpop.eup %1818 }
 0x674   :  { %v814_v43 = vmax.f32 %v1819_v0, 1e-05 }
 0x675   :  { %v1821_v44 = vpop.eup %1820 }
 0x676   :  { %v914_v45 = vadd.f32 1.0, %v1821_v44  ;;  %v815_v29 = vmin.f32 %v814_v43, 1000000.0 }
 0x678   :  { %1822 = vlog2.f32 %v914_v45  ;;  %816 = vst [vmem:[#allocation24] sm:$0xff] %v815_v29 }
 0x682   :  { %v1823_v47 = vpop.eup %1822 }
 0x683   :  { %v916_v53 = vmul.f32 0.6931472, %v1823_v47 }
 0x684   :  { %v1010_v54 = vpop.f32.mrb[8].mxu0  ;;  %v1129_v1 = vpop.f32.mrb[6].mxu1 }
 0x685   :  { %v917_v55 = vsel %vm910_vm2, %v907_v37, %v916_v53  ;;  %v1011_v56 = vadd.f32 %v1245_v50, %v1010_v54  ;;  %v1130_v57 = vadd.f32 %v1129_v1, %v1056_v46  ;;  %v1585_v58 = vpop.f32.mrb[9].mxu0  ;;  %v1131_v59 = vpop.f32.mrb[7].mxu1 }
 0x686   :  { %v918_v61 = vmax.f32 %v917_v55, 0.0001  ;;  %v1132_v62 = vadd.f32 %v1131_v59, %v1060_v52 }
 0x687   :  { %v1014_v63 = vmul.f32 0.5, %v1011_v56  ;;  %v1137_v2 = vadd.f32 %v1136_v60, %v1130_v57 }
 0x688   :  { %v1146_v49 = vmax.f32 %v1132_v62, 0.0  ;;  %v919_v3 = vmin.f32 %v918_v61, 10000.0 }
 0x689   :  { %1824 = vtanh.f32 %v1014_v63  ;;  %v1138_v5 = vmax.f32 %v1137_v2, 0.0 }
 0x68a   :  { %1147 = vst [vmem:[#allocation30] sm:$0xff] %v1146_v49  ;;  %920 = vst [vmem:[#allocation26] sm:$0xff] %v919_v3 }
 0x68b   :  { %v1139_v48 = vadd.f32 1.0, %v1138_v5 }
 0x68d   :  { %1826 = vrcp.f32 %v1139_v48 }
 0x693   :  { %v1825_v51 = vpop.eup %1824 }
 0x694   :  { %v1016_v6 = vadd.f32 1.0, %v1825_v51 }
 0x696   :  { %v1017_v7 = vmul.f32 0.5, %v1016_v6 }
 0x697   :  { %v2967_v8 = vpop.eup %1826 }
 0x698   :  { %1141 = vadd.xlane.f32.xlu0 %v2967_v8  ;;  %1018 = vst [vmem:[#allocation27] sm:$0xff] %v1017_v7 }
 0x699   :  { %2127 = shalt.err (!%p2124_p10)
}
 0x69a   :  { %s2128_s14 = scalar_lea.hbm %s3064_s21, 128 }
 0x69b   :  { %p2129_p11 = scmp.ne.s32.totalorder %s3064_s21, %s2128_s14  ;;  %p2132_p12 = scmp.lt.u32.totalorder %s2128_s14, %s3064_s21 }
 0x69d   :  { %p2134_p13 = pnand %p2132_p12, %p2129_p11 }
 0x69f   :  { %2137 = shalt.err (!%p2134_p13)
}
 0x6a0   :  { %1167 = dma.vmem_to_hbm [thread:$0]  %s1165_s5, 128, %s3064_s21, [#allocation25]  }
 0x6a1   :  { %s2138_s28 = scalar_lea.vmem %s1185_s17, 128  ;;  %p2143_p1 = scmp.lt.s32.totalorder %s1185_s17, %s1185_s17 }
 0x6a2   :  { %p2139_p0 = scmp.ne.s32.totalorder %s1185_s17, %s2138_s28  ;;  %p2144_p2 = scmp.lt.s32.totalorder %s2138_s28, %s2138_s28 }
 0x6a4   :  { %p2145_p3 = por %p2144_p2, %p2143_p1 }
 0x6a6   :  { %p2146_p4 = pnand %p2145_p3, %p2139_p0 }
 0x6a8   :  { %2149 = shalt.err (!%p2146_p4)
}
 0x6a9   :  { %s2150_s8 = scalar_lea.hbm %s3066_s23, 128 }
 0x6aa   :  { %p2151_p5 = scmp.ne.s32.totalorder %s3066_s23, %s2150_s8  ;;  %p2154_p6 = scmp.lt.u32.totalorder %s2150_s8, %s3066_s23 }
 0x6ac   :  { %p2156_p7 = pnand %p2154_p6, %p2151_p5 }
 0x6ae   :  { %2159 = shalt.err (!%p2156_p7)
}
 0x6af   :  { %1187 = dma.vmem_to_hbm [thread:$0]  %s1185_s17, 128, %s3066_s23, [#allocation28]  }
 0x6b0   :  { %s2292_s24 = smov [#allocation23]   ;;  %s2293_s15 = smov [#allocation26]  }
 0x6b1   :  { %s1154_s18 = sshll.u32 %s2292_s24, 4  ;;  %s1174_s19 = sshll.u32 %s2293_s15, 4  ;;  %s1155_s18 = int_to_ptr.vmem [resolvable:$true] %s1154_s18  ;;  %s1175_s19 = int_to_ptr.vmem [resolvable:$true] %s1174_s19 }
 0x6b2   :  { %s2160_s5 = scalar_lea.vmem %s1155_s18, 256  ;;  %p2165_p9 = scmp.lt.s32.totalorder %s1155_s18, %s1155_s18 }
 0x6b3   :  { %p2161_p8 = scmp.ne.s32.totalorder %s1155_s18, %s2160_s5  ;;  %p2166_p10 = scmp.lt.s32.totalorder %s2160_s5, %s2160_s5 }
 0x6b5   :  { %p2167_p11 = por %p2166_p10, %p2165_p9 }
 0x6b7   :  { %p2168_p12 = pnand %p2167_p11, %p2161_p8 }
 0x6b9   :  { %2171 = shalt.err (!%p2168_p12)
}
 0x6ba   :  { %s2172_s12 = scalar_lea.hbm %s3063_s20, 256 }
 0x6bb   :  { %p2173_p13 = scmp.ne.s32.totalorder %s3063_s20, %s2172_s12  ;;  %p2176_p0 = scmp.lt.u32.totalorder %s2172_s12, %s3063_s20 }
 0x6bd   :  { %p2178_p1 = pnand %p2176_p0, %p2173_p13 }
 0x6bf   :  { %2181 = shalt.err (!%p2178_p1)
}
 0x6c0   :  { %1157 = dma.vmem_to_hbm [thread:$0]  %s1155_s18, 256, %s3063_s20, [#allocation4]  }
 0x6c1   :  { %s2182_s13 = scalar_lea.vmem %s1175_s19, 128  ;;  %p2187_p3 = scmp.lt.s32.totalorder %s1175_s19, %s1175_s19 }
 0x6c2   :  { %p2183_p2 = scmp.ne.s32.totalorder %s1175_s19, %s2182_s13  ;;  %p2188_p4 = scmp.lt.s32.totalorder %s2182_s13, %s2182_s13 }
 0x6c4   :  { %p2189_p5 = por %p2188_p4, %p2187_p3 }
 0x6c6   :  { %p2190_p6 = pnand %p2189_p5, %p2183_p2 }
 0x6c8   :  { %2193 = shalt.err (!%p2190_p6)
}
 0x6c9   :  { %s2194_s26 = scalar_lea.hbm %s3065_s22, 128 }
 0x6ca   :  { %p2195_p7 = scmp.ne.s32.totalorder %s3065_s22, %s2194_s26  ;;  %p2198_p8 = scmp.lt.u32.totalorder %s2194_s26, %s3065_s22 }
 0x6cc   :  { %p2200_p9 = pnand %p2198_p8, %p2195_p7 }
 0x6ce   :  { %2203 = shalt.err (!%p2200_p9)
}
 0x6cf   :  { %1177 = dma.vmem_to_hbm [thread:$0]  %s1175_s19, 128, %s3065_s22, [#allocation25]  }
 0x6d0   :  { %s2294_s29 = smov [#allocation30]  }
 0x6d1   :  { %s1204_s27 = sshll.u32 %s2294_s29, 4  ;;  %s1205_s27 = int_to_ptr.vmem [resolvable:$true] %s1204_s27 }
 0x6d2   :  { %s2204_s1 = scalar_lea.vmem %s1205_s27, 128  ;;  %p2209_p11 = scmp.lt.s32.totalorder %s1205_s27, %s1205_s27 }
 0x6d3   :  { %p2205_p10 = scmp.ne.s32.totalorder %s1205_s27, %s2204_s1  ;;  %p2210_p12 = scmp.lt.s32.totalorder %s2204_s1, %s2204_s1 }
 0x6d5   :  { %p2211_p13 = por %p2210_p12, %p2209_p11 }
 0x6d7   :  { %p2212_p0 = pnand %p2211_p13, %p2205_p10 }
 0x6d9   :  { %2215 = shalt.err (!%p2212_p0)
}
 0x6da   :  { %s2216_s24 = scalar_lea.hbm %s3068_s25, 128 }
 0x6db   :  { %p2217_p1 = scmp.ne.s32.totalorder %s3068_s25, %s2216_s24  ;;  %p2220_p2 = scmp.lt.u32.totalorder %s2216_s24, %s3068_s25 }
 0x6dd   :  { %p2222_p3 = pnand %p2220_p2, %p2217_p1 }
 0x6df   :  { %2225 = shalt.err (!%p2222_p3)
}
 0x6e0   :  { %1207 = dma.vmem_to_hbm [thread:$0]  %s1205_s27, 128, %s3068_s25, [#allocation31]  }
 0x6e1   :  { %s2295_s4 = smov [#allocation29]  }
 0x6e2   :  { %s1194_s12 = sshll.u32 %s2295_s4, 4  ;;  %s1195_s12 = int_to_ptr.vmem [resolvable:$true] %s1194_s12 }
 0x6e3   :  { %s2226_s6 = scalar_lea.vmem %s1195_s12, 128  ;;  %p2231_p5 = scmp.lt.s32.totalorder %s1195_s12, %s1195_s12 }
 0x6e4   :  { %p2227_p4 = scmp.ne.s32.totalorder %s1195_s12, %s2226_s6  ;;  %p2232_p6 = scmp.lt.s32.totalorder %s2226_s6, %s2226_s6 }
 0x6e6   :  { %p2233_p7 = por %p2232_p6, %p2231_p5 }
 0x6e8   :  { %p2234_p8 = pnand %p2233_p7, %p2227_p4 }
 0x725   :  { %v1142_v9 = vpop.xlane.xlu0 %1141 }
 0x726   :  { %1828 = vrcp.f32 %v1142_v9 }
 0x730   :  { %v1829_v10 = vpop.eup %1828 }
 0x731   :  { %v1144_v11 = vmul.f32 %v1829_v10, %v2967_v8 }
 0x733   :  { %1145 = vst [vmem:[#allocation29] sm:$0xff] %v1144_v11 }
 0x734   :  { %2237 = shalt.err (!%p2234_p8)
}
 0x735   :  { %s3100_s17 = sld [smem:[#allocation53_spill]] }
 0x73b   :  { %s2238_s25 = scalar_lea.hbm %s3100_s17, 128 }
 0x73c   :  { %p2239_p9 = scmp.ne.s32.totalorder %s3100_s17, %s2238_s25  ;;  %p2242_p10 = scmp.lt.u32.totalorder %s2238_s25, %s3100_s17 }
 0x73e   :  { %p2244_p11 = pnand %p2242_p10, %p2239_p9 }
 0x740   :  { %2247 = shalt.err (!%p2244_p11)
}
 0x741   :  { %1197 = dma.vmem_to_hbm [thread:$0]  %s1195_s12, 128, %s3100_s17, [#allocation28]  }
 0x742   :  { %2262 = dma.done.wait [#allocation4], 256  }
 0x743   :  { %2263 = vsyncadd [#allocation4], 4294967040 }
 0x744   :  { %2264 = dma.done.wait [#allocation25], 256  }
 0x745   :  { %2265 = vsyncadd [#allocation25], 4294967040 }
 0x746   :  { %2266 = dma.done.wait [#allocation28], 256  }
 0x747   :  { %2267 = vsyncadd [#allocation28], 4294967040 }
 0x748   :  { %2268 = dma.done.wait [#allocation31], 128  }
 0x749   :  { %2269 = vsyncadd [#allocation31], 4294967168 }
 0x74a   :  { %1226 = vsyncpa [#allocation3], 1 }
 0x74b   :  { %1227 = vsyncpa [#allocation6], 1 }
 0x74c   :  { %1228 = vsyncpa [#allocation9], 1 }
 0x74d   :  { %1229 = vsyncpa [#allocation12], 1 }
 0x74e   :  { %1230 = vsyncpa [#allocation15], 1 }
 0x74f   :  { %1231 = vsyncpa [#allocation18], 1 }
 0x750   :  { %1232 = vsyncpa [#allocation21], 1 }
 0x751   :  { %1233 = vsyncpa [#allocation4], 1 }
 0x752   :  { %1234 = vsyncpa [#allocation25], 1 }
 0x753   :  { %1235 = vsyncpa [#allocation28], 1 }
 0x754   :  { %1236 = vsyncpa [#allocation31], 1 }

</bundles_post_ra>
